<compile_context>
chip_gen: v6e
topology: v6e:2x2x1
jax: 0.10.0
libtpu: 0.0.40
codegen_flags: <defaults>
</compile_context>

<pallas_src>
import functools

import jax
import jax.numpy as jnp
from jax import lax
from jax.experimental import pallas as pl
from jax.experimental.pallas import tpu as pltpu


def _round_up(x, m):
    return (x + m - 1) // m * m


def clusternet_kernel(x_ref, mu0_ref, mu_out_ref, r_out_ref, *, beta, k, d):
    eps = 1e-8  # torch.cosine_similarity eps
    _, dp = x_ref.shape
    kp = mu0_ref.shape[0]

    x = x_ref[...].astype(jnp.float32)          # (N, Dp), zero-padded lanes >= d

    # Double row-normalization (matches diag(1/||e||) @ e applied twice).
    e = x * lax.rsqrt(jnp.sum(x * x, axis=1, keepdims=True))
    e = e * lax.rsqrt(jnp.sum(e * e, axis=1, keepdims=True))

    # Lane masks (2-D iotas; hoisted out of the loop).
    d_lanes = lax.broadcasted_iota(jnp.int32, (1, dp), 1)        # (1, Dp)
    k_lanes = lax.broadcasted_iota(jnp.int32, (1, kp), 1)        # (1, Kp)
    valid_d = d_lanes < d                                        # real feature lanes
    valid_k = k_lanes < k                                        # real cluster lanes

    # e with a fused "ones" lane at column d: the cluster-mean matmul then
    # also produces the per-cluster responsibility sum for free.
    e_aug = jnp.where(d_lanes == d, jnp.float32(1.0), e)         # (N, Dp)

    mu = mu0_ref[...].astype(jnp.float32)                        # (Kp, Dp), zero pad

    def softmax_masked(logits):
        logits = jnp.where(valid_k, logits, -jnp.inf)            # kill padded clusters
        m = jnp.max(logits, axis=1, keepdims=True)
        p = jnp.exp(logits - m)
        return p * pl.reciprocal(jnp.sum(p, axis=1, keepdims=True), approx=False)

    # Two soft-kmeans iterations (forward() = cluster(init) then cluster(mu1)).
    for _ in range(2):
        # cosine similarity: fold beta / max(||mu||, eps) into mu pre-matmul.
        mu_sq = jnp.sum(mu * mu, axis=1, keepdims=True)          # (Kp, 1)
        mu_hat = mu * (beta * lax.rsqrt(jnp.maximum(mu_sq, eps * eps)))
        logits = lax.dot_general(e, mu_hat, (((1,), (1,)), ((), ())),
                                 preferred_element_type=jnp.float32)   # (N, Kp)
        r = softmax_masked(logits)                                # (N, Kp)

        # (Kp, Dp): lanes [0, d) = sum_n r*e ; lane d = sum_n r (cluster_r).
        cm_aug = lax.dot_general(r, e_aug, (((0,), (0,)), ((), ())),
                                 preferred_element_type=jnp.float32)
        cluster_r = cm_aug[:, d:d + 1]                            # (Kp, 1)
        # Padded clusters have exactly zero responsibility; guard only those.
        inv_r = pl.reciprocal(jnp.where(cluster_r > 0, cluster_r, 1.0),
                              approx=False)
        mu = jnp.where(valid_d, cm_aug * inv_r, 0.0)              # (Kp, Dp)

    # Final assignments: raw dot product with un-normalized mu (as in cluster()).
    logits = beta * lax.dot_general(e, mu, (((1,), (1,)), ((), ())),
                                    preferred_element_type=jnp.float32)
    r = softmax_masked(logits)

    mu_out_ref[...] = mu.astype(mu_out_ref.dtype)
    r_out_ref[...] = r.astype(r_out_ref.dtype)


def clusternet_forward(x, mu_init, beta):
    """Pallas implementation of ClusterNet.forward(x). Returns (mu, r)."""
    n, d = x.shape
    k = mu_init.shape[0]
    # Pad feature / cluster axes to full 128-lane width (d+1 leaves room for
    # the fused "ones" lane that yields cluster_r inside the MXU matmul).
    dp = _round_up(d + 1, 128)
    kp = _round_up(k, 128)

    xp = jnp.zeros((n, dp), jnp.float32).at[:, :d].set(x.astype(jnp.float32))
    mup = jnp.zeros((kp, dp), jnp.float32).at[:k, :d].set(
        mu_init.astype(jnp.float32))

    kern = functools.partial(clusternet_kernel, beta=float(beta), k=k, d=d)
    mu_pad, r_pad = pl.pallas_call(
        kern,
        out_shape=(
            jax.ShapeDtypeStruct((kp, dp), jnp.float32),
            jax.ShapeDtypeStruct((n, kp), jnp.float32),
        ),
        in_specs=[
            pl.BlockSpec(memory_space=pltpu.MemorySpace.VMEM),
            pl.BlockSpec(memory_space=pltpu.MemorySpace.VMEM),
        ],
        out_specs=(
            pl.BlockSpec(memory_space=pltpu.MemorySpace.VMEM),
            pl.BlockSpec(memory_space=pltpu.MemorySpace.VMEM),
        ),
        compiler_params=pltpu.CompilerParams(
            # Keep the scoped budget comfortably under v7x's 64 MiB physical
            # VMEM (also fine on v5e/v6e's 128 MiB).
            vmem_limit_bytes=32 * 1024 * 1024,
        ),
    )(xp, mup)
    # TODO(synk): for N beyond VMEM capacity, grid over N with a 3-phase
    # (mu-update, mu-update, assign) accumulator structure, a VMEM scratch for
    # the running cluster sums, and a "parallel" N axis so v7x's two
    # TensorCores split the row-parallel work.
    return mu_pad[:k, :d], r_pad[:, :k]


def _reference(x, mu0, beta):
    """Pure-JAX reference mirroring the PyTorch forward pass."""
    eps = 1e-8
    e = x / jnp.linalg.norm(x, axis=1, keepdims=True)
    e = e / jnp.linalg.norm(e, axis=1, keepdims=True)
    mu = mu0
    for _ in range(2):
        en = jnp.maximum(jnp.linalg.norm(e, axis=1, keepdims=True), eps)
        mn = jnp.maximum(jnp.linalg.norm(mu, axis=1, keepdims=True), eps)
        dist = (e @ mu.T) / (en * mn.T)
        r = jax.nn.softmax(beta * dist, axis=1)
        mu = (r.T @ e) / jnp.sum(r, axis=0)[:, None]
    r = jax.nn.softmax(beta * (e @ mu.T), axis=1)
    return mu, r


if __name__ == "__main__":
    # Small shapes consistent with the module: N embeddings of dim out_dim=D,
    # K clusters, temperature beta.
    N, D, K, BETA = 64, 32, 8, 5.0

    key = jax.random.PRNGKey(0)
    kx, kmu = jax.random.split(key)
    x = jax.random.normal(kx, (N, D), dtype=jnp.float32)
    # self.init = torch.rand(k, out_dim)  -> deterministic uniform [0, 1)
    mu_init = jax.random.uniform(kmu, (K, D), dtype=jnp.float32)

    mu, r = clusternet_forward(x, mu_init, BETA)
    jax.block_until_ready((mu, r))

    mu_ref, r_ref = _reference(x, mu_init, BETA)
    assert mu.shape == (K, D) and r.shape == (N, K)
    assert jnp.allclose(mu, mu_ref, atol=2e-4, rtol=2e-4), \
        float(jnp.max(jnp.abs(mu - mu_ref)))
    assert jnp.allclose(r, r_ref, atol=2e-4, rtol=2e-4), \
        float(jnp.max(jnp.abs(r - r_ref)))

    print("KERNEL_OK")
</pallas_src>

<mosaic_0001>
module attributes {stable_mosaic.version = 11 : i64} {
  func.func @clusternet_kernel(%arg0: memref<64x128xf32, #tpu.memory_space<vmem>>, %arg1: memref<128x128xf32, #tpu.memory_space<vmem>>, %arg2: memref<128x128xf32, #tpu.memory_space<vmem>>, %arg3: memref<64x128xf32, #tpu.memory_space<vmem>>) attributes {dimension_semantics = [], scalar_prefetch = 0 : i64, scratch_operands = 0 : i64, tpu.core_type = #tpu.core_type<tc>} {
    %c0 = arith.constant 0 : index
    %c0_0 = arith.constant 0 : index
    %0 = vector.load %arg0[%c0, %c0_0] : memref<64x128xf32, #tpu.memory_space<vmem>>, vector<64x128xf32>
    %1 = arith.mulf %0, %0 : vector<64x128xf32>
    %cst = arith.constant dense<0.000000e+00> : vector<64xf32>
    %2 = vector.multi_reduction <add>, %1, %cst [1] : vector<64x128xf32> to vector<64xf32>
    %3 = vector.shape_cast %2 : vector<64xf32> to vector<64x1xf32>
    %4 = math.rsqrt %3 : vector<64x1xf32>
    %5 = vector.broadcast %4 : vector<64x1xf32> to vector<64x128xf32>
    %6 = arith.mulf %0, %5 : vector<64x128xf32>
    %7 = arith.mulf %6, %6 : vector<64x128xf32>
    %cst_1 = arith.constant dense<0.000000e+00> : vector<64xf32>
    %8 = vector.multi_reduction <add>, %7, %cst_1 [1] : vector<64x128xf32> to vector<64xf32>
    %9 = vector.shape_cast %8 : vector<64xf32> to vector<64x1xf32>
    %10 = math.rsqrt %9 : vector<64x1xf32>
    %11 = vector.broadcast %10 : vector<64x1xf32> to vector<64x128xf32>
    %12 = arith.mulf %6, %11 : vector<64x128xf32>
    %13 = tpu.iota {dimensions = array<i32: 1>} : vector<1x128xi32>
    %14 = tpu.iota {dimensions = array<i32: 1>} : vector<1x128xi32>
    %c32_i32 = arith.constant 32 : i32
    %15 = vector.broadcast %c32_i32 : i32 to vector<1x128xi32>
    %16 = arith.cmpi slt, %13, %15 : vector<1x128xi32>
    %c8_i32 = arith.constant 8 : i32
    %17 = vector.broadcast %c8_i32 : i32 to vector<1x128xi32>
    %18 = arith.cmpi slt, %14, %17 : vector<1x128xi32>
    %c32_i32_2 = arith.constant 32 : i32
    %19 = vector.broadcast %c32_i32_2 : i32 to vector<1x128xi32>
    %20 = arith.cmpi eq, %13, %19 : vector<1x128xi32>
    %cst_3 = arith.constant 1.000000e+00 : f32
    %21 = vector.shape_cast %20 : vector<1x128xi1> to vector<1x128xi1>
    %22 = vector.broadcast %21 : vector<1x128xi1> to vector<64x128xi1>
    %23 = vector.broadcast %cst_3 : f32 to vector<64x128xf32>
    %24 = arith.select %22, %23, %12 : vector<64x128xi1>, vector<64x128xf32>
    %c0_4 = arith.constant 0 : index
    %c0_5 = arith.constant 0 : index
    %25 = vector.load %arg1[%c0_4, %c0_5] : memref<128x128xf32, #tpu.memory_space<vmem>>, vector<128x128xf32>
    %26 = arith.mulf %25, %25 : vector<128x128xf32>
    %cst_6 = arith.constant dense<0.000000e+00> : vector<128xf32>
    %27 = vector.multi_reduction <add>, %26, %cst_6 [1] : vector<128x128xf32> to vector<128xf32>
    %28 = vector.shape_cast %27 : vector<128xf32> to vector<128x1xf32>
    %cst_7 = arith.constant 1.000000e-16 : f32
    %29 = vector.broadcast %cst_7 : f32 to vector<128x1xf32>
    %30 = arith.maximumf %28, %29 : vector<128x1xf32>
    %31 = math.rsqrt %30 : vector<128x1xf32>
    %cst_8 = arith.constant 5.000000e+00 : f32
    %32 = vector.broadcast %cst_8 : f32 to vector<128x1xf32>
    %33 = arith.mulf %32, %31 : vector<128x1xf32>
    %34 = vector.broadcast %33 : vector<128x1xf32> to vector<128x128xf32>
    %35 = arith.mulf %25, %34 : vector<128x128xf32>
    %cst_9 = arith.constant dense<0.000000e+00> : vector<64x128xf32>
    %36 = tpu.matmul %12, %35, %cst_9 {dimension_numbers = #tpu.dot_dimension_numbers<[1], [1], [0], [0], [0, 0, 1, 0], [], []>} : vector<64x128xf32>, vector<128x128xf32>, vector<64x128xf32> -> vector<64x128xf32>
    %cst_10 = arith.constant 0xFF800000 : f32
    %37 = vector.shape_cast %18 : vector<1x128xi1> to vector<1x128xi1>
    %38 = vector.broadcast %37 : vector<1x128xi1> to vector<64x128xi1>
    %39 = vector.broadcast %cst_10 : f32 to vector<64x128xf32>
    %40 = arith.select %38, %36, %39 : vector<64x128xi1>, vector<64x128xf32>
    %cst_11 = arith.constant dense<0xFF800000> : vector<64xf32>
    %41 = vector.multi_reduction <maximumf>, %40, %cst_11 [1] : vector<64x128xf32> to vector<64xf32>
    %42 = vector.shape_cast %41 : vector<64xf32> to vector<64x1xf32>
    %43 = vector.broadcast %42 : vector<64x1xf32> to vector<64x128xf32>
    %44 = arith.subf %40, %43 : vector<64x128xf32>
    %45 = math.exp %44 : vector<64x128xf32>
    %cst_12 = arith.constant dense<0.000000e+00> : vector<64xf32>
    %46 = vector.multi_reduction <add>, %45, %cst_12 [1] : vector<64x128xf32> to vector<64xf32>
    %47 = vector.shape_cast %46 : vector<64xf32> to vector<64x1xf32>
    %48 = tpu.reciprocal %47 : vector<64x1xf32> -> vector<64x1xf32>
    %49 = vector.broadcast %48 : vector<64x1xf32> to vector<64x128xf32>
    %50 = arith.mulf %45, %49 : vector<64x128xf32>
    %cst_13 = arith.constant dense<0.000000e+00> : vector<128x128xf32>
    %51 = tpu.matmul %50, %24, %cst_13 {dimension_numbers = #tpu.dot_dimension_numbers<[0], [0], [1], [1], [0, 1, 1, 1], [], []>} : vector<64x128xf32>, vector<64x128xf32>, vector<128x128xf32> -> vector<128x128xf32>
    %52 = vector.extract_strided_slice %51 {offsets = [0, 32], sizes = [128, 1], strides = [1, 1]} : vector<128x128xf32> to vector<128x1xf32>
    %cst_14 = arith.constant 0.000000e+00 : f32
    %53 = vector.broadcast %cst_14 : f32 to vector<128x1xf32>
    %54 = arith.cmpf ogt, %52, %53 : vector<128x1xf32>
    %cst_15 = arith.constant 1.000000e+00 : f32
    %55 = vector.broadcast %cst_15 : f32 to vector<128x1xf32>
    %56 = arith.select %54, %52, %55 : vector<128x1xi1>, vector<128x1xf32>
    %57 = tpu.reciprocal %56 : vector<128x1xf32> -> vector<128x1xf32>
    %58 = vector.broadcast %57 : vector<128x1xf32> to vector<128x128xf32>
    %59 = arith.mulf %51, %58 : vector<128x128xf32>
    %cst_16 = arith.constant 0.000000e+00 : f32
    %60 = vector.shape_cast %16 : vector<1x128xi1> to vector<1x128xi1>
    %61 = vector.broadcast %60 : vector<1x128xi1> to vector<128x128xi1>
    %62 = vector.broadcast %cst_16 : f32 to vector<128x128xf32>
    %63 = arith.select %61, %59, %62 : vector<128x128xi1>, vector<128x128xf32>
    %64 = arith.mulf %63, %63 : vector<128x128xf32>
    %cst_17 = arith.constant dense<0.000000e+00> : vector<128xf32>
    %65 = vector.multi_reduction <add>, %64, %cst_17 [1] : vector<128x128xf32> to vector<128xf32>
    %66 = vector.shape_cast %65 : vector<128xf32> to vector<128x1xf32>
    %cst_18 = arith.constant 1.000000e-16 : f32
    %67 = vector.broadcast %cst_18 : f32 to vector<128x1xf32>
    %68 = arith.maximumf %66, %67 : vector<128x1xf32>
    %69 = math.rsqrt %68 : vector<128x1xf32>
    %cst_19 = arith.constant 5.000000e+00 : f32
    %70 = vector.broadcast %cst_19 : f32 to vector<128x1xf32>
    %71 = arith.mulf %70, %69 : vector<128x1xf32>
    %72 = vector.broadcast %71 : vector<128x1xf32> to vector<128x128xf32>
    %73 = arith.mulf %63, %72 : vector<128x128xf32>
    %cst_20 = arith.constant dense<0.000000e+00> : vector<64x128xf32>
    %74 = tpu.matmul %12, %73, %cst_20 {dimension_numbers = #tpu.dot_dimension_numbers<[1], [1], [0], [0], [0, 0, 1, 0], [], []>} : vector<64x128xf32>, vector<128x128xf32>, vector<64x128xf32> -> vector<64x128xf32>
    %cst_21 = arith.constant 0xFF800000 : f32
    %75 = vector.shape_cast %18 : vector<1x128xi1> to vector<1x128xi1>
    %76 = vector.broadcast %75 : vector<1x128xi1> to vector<64x128xi1>
    %77 = vector.broadcast %cst_21 : f32 to vector<64x128xf32>
    %78 = arith.select %76, %74, %77 : vector<64x128xi1>, vector<64x128xf32>
    %cst_22 = arith.constant dense<0xFF800000> : vector<64xf32>
    %79 = vector.multi_reduction <maximumf>, %78, %cst_22 [1] : vector<64x128xf32> to vector<64xf32>
    %80 = vector.shape_cast %79 : vector<64xf32> to vector<64x1xf32>
    %81 = vector.broadcast %80 : vector<64x1xf32> to vector<64x128xf32>
    %82 = arith.subf %78, %81 : vector<64x128xf32>
    %83 = math.exp %82 : vector<64x128xf32>
    %cst_23 = arith.constant dense<0.000000e+00> : vector<64xf32>
    %84 = vector.multi_reduction <add>, %83, %cst_23 [1] : vector<64x128xf32> to vector<64xf32>
    %85 = vector.shape_cast %84 : vector<64xf32> to vector<64x1xf32>
    %86 = tpu.reciprocal %85 : vector<64x1xf32> -> vector<64x1xf32>
    %87 = vector.broadcast %86 : vector<64x1xf32> to vector<64x128xf32>
    %88 = arith.mulf %83, %87 : vector<64x128xf32>
    %cst_24 = arith.constant dense<0.000000e+00> : vector<128x128xf32>
    %89 = tpu.matmul %88, %24, %cst_24 {dimension_numbers = #tpu.dot_dimension_numbers<[0], [0], [1], [1], [0, 1, 1, 1], [], []>} : vector<64x128xf32>, vector<64x128xf32>, vector<128x128xf32> -> vector<128x128xf32>
    %90 = vector.extract_strided_slice %89 {offsets = [0, 32], sizes = [128, 1], strides = [1, 1]} : vector<128x128xf32> to vector<128x1xf32>
    %cst_25 = arith.constant 0.000000e+00 : f32
    %91 = vector.broadcast %cst_25 : f32 to vector<128x1xf32>
    %92 = arith.cmpf ogt, %90, %91 : vector<128x1xf32>
    %cst_26 = arith.constant 1.000000e+00 : f32
    %93 = vector.broadcast %cst_26 : f32 to vector<128x1xf32>
    %94 = arith.select %92, %90, %93 : vector<128x1xi1>, vector<128x1xf32>
    %95 = tpu.reciprocal %94 : vector<128x1xf32> -> vector<128x1xf32>
    %96 = vector.broadcast %95 : vector<128x1xf32> to vector<128x128xf32>
    %97 = arith.mulf %89, %96 : vector<128x128xf32>
    %cst_27 = arith.constant 0.000000e+00 : f32
    %98 = vector.shape_cast %16 : vector<1x128xi1> to vector<1x128xi1>
    %99 = vector.broadcast %98 : vector<1x128xi1> to vector<128x128xi1>
    %100 = vector.broadcast %cst_27 : f32 to vector<128x128xf32>
    %101 = arith.select %99, %97, %100 : vector<128x128xi1>, vector<128x128xf32>
    %cst_28 = arith.constant dense<0.000000e+00> : vector<64x128xf32>
    %102 = tpu.matmul %12, %101, %cst_28 {dimension_numbers = #tpu.dot_dimension_numbers<[1], [1], [0], [0], [0, 0, 1, 0], [], []>} : vector<64x128xf32>, vector<128x128xf32>, vector<64x128xf32> -> vector<64x128xf32>
    %cst_29 = arith.constant 5.000000e+00 : f32
    %103 = vector.broadcast %cst_29 : f32 to vector<64x128xf32>
    %104 = arith.mulf %103, %102 : vector<64x128xf32>
    %cst_30 = arith.constant 0xFF800000 : f32
    %105 = vector.shape_cast %18 : vector<1x128xi1> to vector<1x128xi1>
    %106 = vector.broadcast %105 : vector<1x128xi1> to vector<64x128xi1>
    %107 = vector.broadcast %cst_30 : f32 to vector<64x128xf32>
    %108 = arith.select %106, %104, %107 : vector<64x128xi1>, vector<64x128xf32>
    %cst_31 = arith.constant dense<0xFF800000> : vector<64xf32>
    %109 = vector.multi_reduction <maximumf>, %108, %cst_31 [1] : vector<64x128xf32> to vector<64xf32>
    %110 = vector.shape_cast %109 : vector<64xf32> to vector<64x1xf32>
    %111 = vector.broadcast %110 : vector<64x1xf32> to vector<64x128xf32>
    %112 = arith.subf %108, %111 : vector<64x128xf32>
    %113 = math.exp %112 : vector<64x128xf32>
    %cst_32 = arith.constant dense<0.000000e+00> : vector<64xf32>
    %114 = vector.multi_reduction <add>, %113, %cst_32 [1] : vector<64x128xf32> to vector<64xf32>
    %115 = vector.shape_cast %114 : vector<64xf32> to vector<64x1xf32>
    %116 = tpu.reciprocal %115 : vector<64x1xf32> -> vector<64x1xf32>
    %117 = vector.broadcast %116 : vector<64x1xf32> to vector<64x128xf32>
    %118 = arith.mulf %113, %117 : vector<64x128xf32>
    %c0_33 = arith.constant 0 : index
    %c0_34 = arith.constant 0 : index
    %119 = vector.load %arg2[%c0_33, %c0_34] : memref<128x128xf32, #tpu.memory_space<vmem>>, vector<128x128xf32>
    tpu.vector_store %arg2[%c0_33, %c0_34], %101 {strides = array<i32>} : memref<128x128xf32, #tpu.memory_space<vmem>>, vector<128x128xf32>,
    %c0_35 = arith.constant 0 : index
    %c0_36 = arith.constant 0 : index
    %120 = vector.load %arg3[%c0_35, %c0_36] : memref<64x128xf32, #tpu.memory_space<vmem>>, vector<64x128xf32>
    tpu.vector_store %arg3[%c0_35, %c0_36], %118 {strides = array<i32>} : memref<64x128xf32, #tpu.memory_space<vmem>>, vector<64x128xf32>,
    return
  }
}

</mosaic_0001>

<bundles_post_ra>
// kernel: tpu_custom_call.1
= control target key start
LH: loop header
LB: loop body
LE: loop exit
PB: predicated region body
PF: predicated region fallthrough
CT: control target
= control target key end

     0   :  { %9 = vsyncpa [#allocation3], 0  ;;  %s3297_s0 = inlined_call_operand.hbm [shape: f32[64,128], index: 0, kind: input, shape index: {}]   ;;  %s3298_s1 = inlined_call_operand.hbm [shape: f32[128,128], index: 1, kind: input, shape index: {}]   ;;  %s3299_s2 = inlined_call_operand.hbm [shape: f32[128,128], index: 2, kind: output, shape index: {0}]   ;;  %s3300_s3 = inlined_call_operand.hbm [shape: f32[64,128], index: 3, kind: output, shape index: {1}]  }
   0x1   :  { %10 = vsyncpa [#allocation6], 0 }
   0x2   :  { %11 = vsyncpa [#allocation4], 0 }
   0x3   :  { %12 = vsyncpa [#allocation9], 0  ;;  %s2516_s12 = smov [#allocation2]  }
   0x4   :  { %s18_s13 = sshll.u32 %s2516_s12, 4  ;;  %s19_s13 = int_to_ptr.vmem [resolvable:$true] %s18_s13 }
   0x5   :  { %s2436_s14 = scalar_lea.vmem %s19_s13, 1024  ;;  %p2441_p1 = scmp.lt.s32.totalorder %s19_s13, %s19_s13 }
   0x6   :  { %p2437_p0 = scmp.ne.s32.totalorder %s19_s13, %s2436_s14  ;;  %p2442_p2 = scmp.lt.s32.totalorder %s2436_s14, %s2436_s14 }
   0x8   :  { %p2443_p3 = por %p2442_p2, %p2441_p1 }
   0xa   :  { %p2444_p4 = pnand %p2443_p3, %p2437_p0 }
   0xc   :  { %2447 = shalt.err (!%p2444_p4)
}
   0xd   :  { %s2517_s15 = smov 128   ;;  %s2518_s16 = smov 8  }
   0xe   :  { %24 = dma.hbm_to_vmem [thread:$0]  %s3297_s0, 1024, %s19_s13, [#allocation3], %s2517_s15, %s2517_s15, %s2518_s16  }
   0xf   :  { %s2519_s19 = smov [#allocation5]  }
  0x10   :  { %s30_s20 = sshll.u32 %s2519_s19, 4  ;;  %s31_s20 = int_to_ptr.vmem [resolvable:$true] %s30_s20 }
  0x11   :  { %s2456_s21 = scalar_lea.vmem %s31_s20, 2048  ;;  %p2461_p6 = scmp.lt.s32.totalorder %s31_s20, %s31_s20 }
  0x12   :  { %p2457_p5 = scmp.ne.s32.totalorder %s31_s20, %s2456_s21  ;;  %p2462_p7 = scmp.lt.s32.totalorder %s2456_s21, %s2456_s21 }
  0x14   :  { %p2463_p8 = por %p2462_p7, %p2461_p6 }
  0x16   :  { %p2464_p9 = pnand %p2463_p8, %p2457_p5 }
  0x18   :  { %2467 = shalt.err (!%p2464_p9)
}
  0x19   :  { %36 = dma.hbm_to_vmem [thread:$0]  %s3298_s1, 2048, %s31_s20, [#allocation6], %s2517_s15, %s2517_s15, %s2518_s16  }
  0x1a   :  { %2508 = dma.done.wait [#allocation3], 1024  }
  0x1b   :  { %2509 = vsyncadd [#allocation3], 4294966272 }
  0x1c   :  { %2510 = dma.done.wait [#allocation6], 2048  }
  0x1d   :  { %2511 = vsyncadd [#allocation6], 4294965248  ;;  %v2555_v0 = vld [vmem:[#allocation2] sm:$0xff]  ;;  %v2557_v1 = vld [vmem:[#allocation2 + $0x10] sm:$0xff]  ;;  %vm493_vm2 = vcmask 523264   ;;  %s2521_s0 = smov [#allocation7]  }
  0x1e   :  { %v2559_v2 = vld [vmem:[#allocation2 + $0x8] sm:$0xff]  ;;  %v51_v3 = vmul.f32 %v2555_v0, %v2555_v0  ;;  %v53_v4 = vmul.f32 %v2557_v1, %v2557_v1  ;;  %v2565_v5 = vld [vmem:[#allocation2 + $0x18] sm:$0xff]  ;;  %v2571_v8 = vld [vmem:[#allocation2 + $0x20] sm:$0xff]  ;;  %s1753_s1 = sshll.u32 %s2521_s0, 4  ;;  %s1754_s1 = int_to_ptr.vmem [resolvable:$true] %s1753_s1 }
  0x1f   :  { %v52_v6 = vmul.f32 %v2559_v2, %v2559_v2  ;;  %v54_v7 = vmul.f32 %v2565_v5, %v2565_v5  ;;  %v2573_v9 = vld [vmem:[#allocation2 + $0x28] sm:$0xff]  ;;  %v55_v10 = vmul.f32 %v2571_v8, %v2571_v8  ;;  %v2579_v12 = vld [vmem:[#allocation2 + $0x30] sm:$0xff]  ;;  %v2581_v13 = vld [vmem:[#allocation2 + $0x38] sm:$0xff]  ;;  %s2468_s24 = scalar_lea.vmem %s1754_s1, 2048  ;;  %p2473_p11 = scmp.lt.s32.totalorder %s1754_s1, %s1754_s1 }
  0x20   :  { %59 = vadd.xlane.f32.xlu0 %v51_v3  ;;  %63 = vadd.xlane.f32.xlu1 %v53_v4  ;;  %v56_v11 = vmul.f32 %v2573_v9, %v2573_v9  ;;  %v57_v14 = vmul.f32 %v2579_v12, %v2579_v12  ;;  %v58_v15 = vmul.f32 %v2581_v13, %v2581_v13  ;;  %v2587_v16 = vld [vmem:[#allocation5 + $0x78] sm:$0xff]  ;;  %v2589_v17 = vld [vmem:[#allocation5 + $0x70] sm:$0xff]  ;;  %v2595_v20 = vld [vmem:[#allocation5 + $0x68] sm:$0xff]  ;;  %p2469_p10 = scmp.ne.s32.totalorder %s1754_s1, %s2468_s24  ;;  %p2474_p12 = scmp.lt.s32.totalorder %s2468_s24, %s2468_s24 }
  0x21   :  { %v177_v18 = vmul.f32 %v2587_v16, %v2587_v16  ;;  %v176_v19 = vmul.f32 %v2589_v17, %v2589_v17  ;;  %v2597_v21 = vld [vmem:[#allocation5 + $0x60] sm:$0xff]  ;;  %v175_v22 = vmul.f32 %v2595_v20, %v2595_v20  ;;  %v2603_v24 = vld [vmem:[#allocation5 + $0x58] sm:$0xff]  ;;  %v2605_v25 = vld [vmem:[#allocation5 + $0x50] sm:$0xff] }
  0x22   :  { %v174_v23 = vmul.f32 %v2597_v21, %v2597_v21  ;;  %v173_v26 = vmul.f32 %v2603_v24, %v2603_v24  ;;  %v172_v27 = vmul.f32 %v2605_v25, %v2605_v25  ;;  %v2611_v28 = vld [vmem:[#allocation5 + $0x48] sm:$0xff]  ;;  %v2613_v29 = vld [vmem:[#allocation5 + $0x40] sm:$0xff]  ;;  %v2619_v32 = vld [vmem:[#allocation5 + $0x38] sm:$0xff]  ;;  %p2475_p13 = por %p2474_p12, %p2473_p11 }
  0x23   :  { %v171_v30 = vmul.f32 %v2611_v28, %v2611_v28  ;;  %v170_v31 = vmul.f32 %v2613_v29, %v2613_v29  ;;  %v2621_v33 = vld [vmem:[#allocation5 + $0x30] sm:$0xff]  ;;  %v169_v34 = vmul.f32 %v2619_v32, %v2619_v32  ;;  %v2627_v36 = vld [vmem:[#allocation5 + $0x28] sm:$0xff]  ;;  %v2629_v37 = vld [vmem:[#allocation5 + $0x20] sm:$0xff] }
  0x24   :  { %61 = vadd.xlane.f32.xlu0 %v52_v6  ;;  %65 = vadd.xlane.f32.xlu1 %v54_v7  ;;  %v168_v35 = vmul.f32 %v2621_v33, %v2621_v33  ;;  %v167_v38 = vmul.f32 %v2627_v36, %v2627_v36  ;;  %v166_v39 = vmul.f32 %v2629_v37, %v2629_v37  ;;  %v2635_v40 = vld [vmem:[#allocation5 + $0x18] sm:$0xff]  ;;  %v2637_v41 = vld [vmem:[#allocation5 + $0x10] sm:$0xff]  ;;  %v2643_v44 = vld [vmem:[#allocation5 + $0x8] sm:$0xff]  ;;  %p2476_p0 = pnand %p2475_p13, %p2469_p10 }
  0x25   :  { %v165_v42 = vmul.f32 %v2635_v40, %v2635_v40  ;;  %v164_v43 = vmul.f32 %v2637_v41, %v2637_v41  ;;  %v2645_v45 = vld [vmem:[#allocation5] sm:$0xff]  ;;  %v163_v46 = vmul.f32 %v2643_v44, %v2643_v44 }
  0x26   :  { %v162_v47 = vmul.f32 %v2645_v45, %v2645_v45 }
  0x28   :  { %67 = vadd.xlane.f32.xlu0 %v55_v10  ;;  %69 = vadd.xlane.f32.xlu1 %v56_v11 }
  0x2c   :  { %71 = vadd.xlane.f32.xlu0 %v57_v14  ;;  %73 = vadd.xlane.f32.xlu1 %v58_v15 }
  0x30   :  { %208 = vadd.xlane.f32.xlu0 %v177_v18  ;;  %206 = vadd.xlane.f32.xlu1 %v176_v19 }
  0x34   :  { %204 = vadd.xlane.f32.xlu0 %v175_v22  ;;  %202 = vadd.xlane.f32.xlu1 %v174_v23 }
  0x38   :  { %200 = vadd.xlane.f32.xlu0 %v173_v26  ;;  %198 = vadd.xlane.f32.xlu1 %v172_v27 }
  0x3c   :  { %196 = vadd.xlane.f32.xlu0 %v171_v30  ;;  %194 = vadd.xlane.f32.xlu1 %v170_v31 }
  0x40   :  { %192 = vadd.xlane.f32.xlu0 %v169_v34  ;;  %190 = vadd.xlane.f32.xlu1 %v168_v35 }
  0x44   :  { %188 = vadd.xlane.f32.xlu0 %v167_v38  ;;  %186 = vadd.xlane.f32.xlu1 %v166_v39 }
  0x48   :  { %184 = vadd.xlane.f32.xlu0 %v165_v42  ;;  %182 = vadd.xlane.f32.xlu1 %v164_v43 }
  0x4c   :  { %180 = vadd.xlane.f32.xlu0 %v163_v46  ;;  %178 = vadd.xlane.f32.xlu1 %v162_v47 }
  0xa9   :  { %v60_v48 = vpop.xlane.xlu0 %59  ;;  %v64_v49 = vpop.xlane.xlu1 %63 }
  0xaa   :  { %2172 = vrsqrt.f32 %v60_v48 }
  0xab   :  { %2174 = vrsqrt.f32 %v64_v49 }
  0xad   :  { %v62_v50 = vpop.xlane.xlu0 %61  ;;  %v66_v51 = vpop.xlane.xlu1 %65 }
  0xae   :  { %2176 = vrsqrt.f32 %v62_v50 }
  0xaf   :  { %2178 = vrsqrt.f32 %v66_v51 }
  0xb1   :  { %v68_v52 = vpop.xlane.xlu0 %67  ;;  %v70_v53 = vpop.xlane.xlu1 %69 }
  0xb2   :  { %2180 = vrsqrt.f32 %v68_v52 }
  0xb3   :  { %2182 = vrsqrt.f32 %v70_v53 }
  0xb5   :  { %v72_v54 = vpop.xlane.xlu0 %71  ;;  %v74_v55 = vpop.xlane.xlu1 %73 }
  0xb6   :  { %2184 = vrsqrt.f32 %v72_v54 }
  0xb7   :  { %v2173_v56 = vpop.eup %2172  ;;  %2186 = vrsqrt.f32 %v74_v55 }
  0xb8   :  { %v2175_v57 = vpop.eup %2174  ;;  %v2652_v58 = vmul.f32 %v2173_v56, %v2555_v0 }
  0xb9   :  { %v2655_v59 = vmul.f32 %v2175_v57, %v2557_v1  ;;  %v209_v60 = vpop.xlane.xlu0 %208  ;;  %v207_v61 = vpop.xlane.xlu1 %206 }
  0xba   :  { %v91_v62 = vmul.f32 %v2652_v58, %v2652_v58  ;;  %v225_v63 = vmax.f32 %v209_v60, 1e-16  ;;  %v224_v3 = vmax.f32 %v207_v61, 1e-16 }
  0xbb   :  { %v2177_v4 = vpop.eup %2176  ;;  %v93_v7 = vmul.f32 %v2655_v59, %v2655_v59 }
  0xbc   :  { %v2179_v6 = vpop.eup %2178  ;;  %99 = vadd.xlane.f32.xlu0 %v91_v62  ;;  %v2662_v10 = vmul.f32 %v2177_v4, %v2559_v2  ;;  %2188 = vrsqrt.f32 %v225_v63 }
  0xbd   :  { %v2665_v0 = vmul.f32 %v2179_v6, %v2565_v5  ;;  %2190 = vrsqrt.f32 %v224_v3  ;;  %v205_v1 = vpop.xlane.xlu0 %204  ;;  %v203_v11 = vpop.xlane.xlu1 %202 }
  0xbe   :  { %v92_v14 = vmul.f32 %v2662_v10, %v2662_v10  ;;  %v223_v15 = vmax.f32 %v205_v1, 1e-16  ;;  %v222_v18 = vmax.f32 %v203_v11, 1e-16 }
  0xbf   :  { %v2181_v19 = vpop.eup %2180  ;;  %v94_v2 = vmul.f32 %v2665_v0, %v2665_v0 }
  0xc0   :  { %v2183_v22 = vpop.eup %2182  ;;  %103 = vadd.xlane.f32.xlu0 %v93_v7  ;;  %101 = vadd.xlane.f32.xlu1 %v92_v14  ;;  %v2672_v23 = vmul.f32 %v2181_v19, %v2571_v8  ;;  %2192 = vrsqrt.f32 %v223_v15 }
  0xc1   :  { %v2675_v5 = vmul.f32 %v2183_v22, %v2573_v9  ;;  %2194 = vrsqrt.f32 %v222_v18  ;;  %v201_v26 = vpop.xlane.xlu0 %200  ;;  %v199_v27 = vpop.xlane.xlu1 %198 }
  0xc2   :  { %v95_v30 = vmul.f32 %v2672_v23, %v2672_v23  ;;  %v221_v31 = vmax.f32 %v201_v26, 1e-16  ;;  %v220_v9 = vmax.f32 %v199_v27, 1e-16 }
  0xc3   :  { %v2185_v34 = vpop.eup %2184  ;;  %v96_v38 = vmul.f32 %v2675_v5, %v2675_v5 }
  0xc4   :  { %v2187_v35 = vpop.eup %2186  ;;  %105 = vadd.xlane.f32.xlu1 %v94_v2  ;;  %107 = vadd.xlane.f32.xlu0 %v95_v30  ;;  %v2682_v8 = vmul.f32 %v2185_v34, %v2579_v12  ;;  %2196 = vrsqrt.f32 %v221_v31 }
  0xc5   :  { %v2685_v39 = vmul.f32 %v2187_v35, %v2581_v13  ;;  %v197_v42 = vpop.xlane.xlu0 %196  ;;  %2198 = vrsqrt.f32 %v220_v9  ;;  %v195_v49 = vpop.xlane.xlu1 %194 }
  0xc6   :  { %v97_v43 = vmul.f32 %v2682_v8, %v2682_v8  ;;  %v219_v47 = vmax.f32 %v197_v42, 1e-16  ;;  %v218_v52 = vmax.f32 %v195_v49, 1e-16 }
  0xc7   :  { %v98_v46 = vmul.f32 %v2685_v39, %v2685_v39 }
  0xc8   :  { %109 = vadd.xlane.f32.xlu1 %v96_v38  ;;  %111 = vadd.xlane.f32.xlu0 %v97_v43  ;;  %2200 = vrsqrt.f32 %v219_v47 }
  0xc9   :  { %v2189_v48 = vpop.eup %2188  ;;  %v193_v55 = vpop.xlane.xlu0 %192  ;;  %2202 = vrsqrt.f32 %v218_v52 }
  0xca   :  { %v2191_v12 = vpop.eup %2190  ;;  %v257_v50 = vmul.f32 5.0, %v2189_v48  ;;  %v217_v62 = vmax.f32 %v193_v55, 1e-16  ;;  %v191_v3 = vpop.xlane.xlu1 %190 }
  0xcb   :  { %v256_v51 = vmul.f32 5.0, %v2191_v12 }
  0xcc   :  { %113 = vadd.xlane.f32.xlu1 %v98_v46  ;;  %v273_v13 = vmul.f32 %v257_v50, %v2587_v16  ;;  %2204 = vrsqrt.f32 %v217_v62 }
  0xcd   :  { %v2193_v53 = vpop.eup %2192  ;;  %v272_v54 = vmul.f32 %v256_v51, %v2589_v17  ;;  %v216_v17 = vmax.f32 %v191_v3, 1e-16  ;;  %v189_v7 = vpop.xlane.xlu0 %188 }
  0xce   :  { %v2195_v56 = vpop.eup %2194  ;;  %v255_v57 = vmul.f32 5.0, %v2193_v53  ;;  %1950 = vmatprep.subr.mxu0 %v273_v13  ;;  %v215_v14 = vmax.f32 %v189_v7, 1e-16  ;;  %v187_v15 = vpop.xlane.xlu1 %186 }
  0xcf   :  { %1951 = vmatpush3.xpose.msra.mxu0 %v273_v13  ;;  %v254_v60 = vmul.f32 5.0, %v2195_v56  ;;  %2206 = vrsqrt.f32 %v216_v17  ;;  %v214_v22 = vmax.f32 %v187_v15, 1e-16 }
  0xd0   :  { %1952 = vmatprep.subr.mxu0 %v272_v54  ;;  %v271_v61 = vmul.f32 %v255_v57, %v2595_v20  ;;  %2208 = vrsqrt.f32 %v215_v14 }
  0xd1   :  { %v2197_v63 = vpop.eup %2196  ;;  %v270_v4 = vmul.f32 %v254_v60, %v2597_v21  ;;  %v185_v2 = vpop.xlane.xlu0 %184  ;;  %2210 = vrsqrt.f32 %v214_v22 }
  0xd2   :  { %v253_v16 = vmul.f32 5.0, %v2197_v63  ;;  %v2199_v6 = vpop.eup %2198  ;;  %v213_v30 = vmax.f32 %v185_v2, 1e-16  ;;  %v183_v31 = vpop.xlane.xlu1 %182 }
  0xd3   :  { %1953 = vmatpush3.xpose.msra.mxu0 %v272_v54  ;;  %v252_v1 = vmul.f32 5.0, %v2199_v6  ;;  %v212_v38 = vmax.f32 %v183_v31, 1e-16 }
  0xd4   :  { %1954 = vmatprep.subr.mxu0 %v271_v61  ;;  %v269_v11 = vmul.f32 %v253_v16, %v2603_v24  ;;  %2212 = vrsqrt.f32 %v213_v30 }
  0xd5   :  { %v2201_v20 = vpop.eup %2200  ;;  %v268_v19 = vmul.f32 %v252_v1, %v2605_v25  ;;  %v181_v9 = vpop.xlane.xlu0 %180  ;;  %2214 = vrsqrt.f32 %v212_v38 }
  0xd6   :  { %v251_v18 = vmul.f32 5.0, %v2201_v20  ;;  %v2203_v21 = vpop.eup %2202  ;;  %v211_v46 = vmax.f32 %v181_v9, 1e-16  ;;  %v179_v47 = vpop.xlane.xlu1 %178 }
  0xd7   :  { %1955 = vmatpush3.xpose.msra.mxu0 %v271_v61  ;;  %v250_v26 = vmul.f32 5.0, %v2203_v21  ;;  %v210_v12 = vmax.f32 %v179_v47, 1e-16 }
  0xd8   :  { %1956 = vmatprep.subr.mxu0 %v270_v4  ;;  %v267_v27 = vmul.f32 %v251_v18, %v2611_v28  ;;  %2216 = vrsqrt.f32 %v211_v46  ;;  %v131_v18 = vlaneseq }
  0xd9   :  { %v2205_v24 = vpop.eup %2204  ;;  %v266_v35 = vmul.f32 %v250_v26, %v2613_v29  ;;  %2218 = vrsqrt.f32 %v210_v12 }
  0xda   :  { %v249_v34 = vmul.f32 5.0, %v2205_v24  ;;  %v2733_v21 = vand.u32 127, %v131_v18 }
  0xdb   :  { %1957 = vmatpush3.xpose.msra.mxu0 %v270_v4 }
  0xdc   :  { %1958 = vmatprep.subr.mxu0 %v269_v11  ;;  %v2207_v25 = vpop.eup %2206  ;;  %v265_v43 = vmul.f32 %v249_v34, %v2619_v32  ;;  %vm135_vm0 = vcmp.eq.s32.totalorder %v2733_v21, 32  ;;  %vm134_vm1 = vcmp.lt.s32.totalorder %v2733_v21, 8 }
  0xdd   :  { %v248_v42 = vmul.f32 5.0, %v2207_v25  ;;  %v2209_v28 = vpop.eup %2208 }
  0xde   :  { %v247_v48 = vmul.f32 5.0, %v2209_v28  ;;  %v2211_v29 = vpop.eup %2210 }
  0xdf   :  { %1959 = vmatpush3.xpose.msra.mxu0 %v269_v11  ;;  %v264_v49 = vmul.f32 %v248_v42, %v2621_v33  ;;  %v246_v50 = vmul.f32 5.0, %v2211_v29 }
  0xe0   :  { %1960 = vmatprep.subr.mxu0 %v268_v19  ;;  %v263_v51 = vmul.f32 %v247_v48, %v2627_v36 }
  0xe1   :  { %v2213_v13 = vpop.eup %2212  ;;  %v262_v52 = vmul.f32 %v246_v50, %v2629_v37 }
  0xe2   :  { %v245_v32 = vmul.f32 5.0, %v2213_v13  ;;  %v2215_v53 = vpop.eup %2214 }
  0xe3   :  { %1961 = vmatpush3.xpose.msra.mxu0 %v268_v19  ;;  %v244_v54 = vmul.f32 5.0, %v2215_v53 }
  0xe4   :  { %1962 = vmatprep.subr.mxu0 %v267_v27  ;;  %v261_v33 = vmul.f32 %v245_v32, %v2635_v40 }
  0xe5   :  { %v2217_v55 = vpop.eup %2216  ;;  %v260_v57 = vmul.f32 %v244_v54, %v2637_v41 }
  0xe6   :  { %v243_v56 = vmul.f32 5.0, %v2217_v55  ;;  %v2219_v60 = vpop.eup %2218 }
  0xe7   :  { %1963 = vmatpush3.xpose.msra.mxu0 %v267_v27  ;;  %v242_v36 = vmul.f32 5.0, %v2219_v60 }
  0xe8   :  { %1964 = vmatprep.subr.mxu0 %v266_v35  ;;  %v259_v61 = vmul.f32 %v243_v56, %v2643_v44 }
  0xe9   :  { %v258_v37 = vmul.f32 %v242_v36, %v2645_v45 }
  0xeb   :  { %1965 = vmatpush3.xpose.msra.mxu0 %v266_v35 }
  0xec   :  { %1966 = vmatprep.subr.mxu0 %v265_v43 }
  0xef   :  { %1967 = vmatpush3.xpose.msra.mxu0 %v265_v43 }
  0xf0   :  { %1968 = vmatprep.subr.mxu0 %v264_v49 }
  0xf3   :  { %1969 = vmatpush3.xpose.msra.mxu0 %v264_v49 }
  0xf4   :  { %1970 = vmatprep.subr.mxu0 %v263_v51 }
  0xf7   :  { %1971 = vmatpush3.xpose.msra.mxu0 %v263_v51 }
  0xf8   :  { %1972 = vmatprep.subr.mxu0 %v262_v52 }
  0xfb   :  { %1973 = vmatpush3.xpose.msra.mxu0 %v262_v52 }
  0xfc   :  { %1974 = vmatprep.subr.mxu0 %v261_v33 }
  0xff   :  { %1975 = vmatpush3.xpose.msra.mxu0 %v261_v33 }
 0x100   :  { %1976 = vmatprep.subr.mxu0 %v260_v57 }
 0x103   :  { %1977 = vmatpush3.xpose.msra.mxu0 %v260_v57 }
 0x104   :  { %1978 = vmatprep.subr.mxu0 %v259_v61 }
 0x107   :  { %1979 = vmatpush3.xpose.msra.mxu0 %v259_v61 }
 0x108   :  { %1980 = vmatprep.subr.mxu0 %v258_v37 }
 0x10b   :  { %1981 = vmatpush3.xpose.msra.mxu0 %v258_v37 }
 0x145   :  { %v100_v40 = vpop.xlane.xlu0 %99 }
 0x146   :  { %2220 = vrsqrt.f32 %v100_v40 }
 0x149   :  { %v102_v62 = vpop.xlane.xlu1 %101  ;;  %v104_v63 = vpop.xlane.xlu0 %103 }
 0x14a   :  { %2222 = vrsqrt.f32 %v102_v62 }
 0x14b   :  { %2224 = vrsqrt.f32 %v104_v63 }
 0x14d   :  { %v106_v41 = vpop.xlane.xlu1 %105  ;;  %v108_v3 = vpop.xlane.xlu0 %107 }
 0x14e   :  { %2226 = vrsqrt.f32 %v106_v41 }
 0x14f   :  { %2228 = vrsqrt.f32 %v108_v3 }
 0x151   :  { %v110_v16 = vpop.xlane.xlu1 %109  ;;  %v112_v4 = vpop.xlane.xlu0 %111 }
 0x152   :  { %2230 = vrsqrt.f32 %v110_v16 }
 0x153   :  { %v2221_v44 = vpop.eup %2220  ;;  %2232 = vrsqrt.f32 %v112_v4 }
 0x154   :  { %v2708_v45 = vmul.f32 %v2221_v44, %v2652_v58 }
 0x155   :  { %v114_v17 = vpop.xlane.xlu1 %113 }
 0x156   :  { %2234 = vrsqrt.f32 %v114_v17  ;;  %1982 = vmatprep.mubr.f32.mxu0 %v2708_v45  ;;  %v2795_v24 = vsel %vm135_vm0, 1.0, %v2708_v45 }
 0x157   :  { %v2223_v6 = vpop.eup %2222 }
 0x158   :  { %v2225_v7 = vpop.eup %2224  ;;  %v2712_v1 = vmul.f32 %v2223_v6, %v2662_v10 }
 0x159   :  { %v2715_v11 = vmul.f32 %v2225_v7, %v2655_v59 }
 0x15a   :  { %1983 = vmatmul.mubr.f32.vlgmr.msra.gmra.mxu0 %v2712_v1  ;;  %v2788_v30 = vsel %vm135_vm0, 1.0, %v2712_v1 }
 0x15b   :  { %v2227_v14 = vpop.eup %2226  ;;  %1985 = vmatprep.mubr.f32.mxu0 %v2715_v11  ;;  %v2781_v27 = vsel %vm135_vm0, 1.0, %v2715_v11 }
 0x15c   :  { %v2229_v20 = vpop.eup %2228  ;;  %v2720_v58 = vmul.f32 %v2227_v14, %v2665_v0 }
 0x15d   :  { %v2723_v15 = vmul.f32 %v2229_v20, %v2672_v23 }
 0x15e   :  { %1986 = vmatmul.mubr.f32.gmra.mxu0 %v2720_v58  ;;  %v2774_v26 = vsel %vm135_vm0, 1.0, %v2720_v58 }
 0x15f   :  { %v2231_v10 = vpop.eup %2230  ;;  %1988 = vmatprep.mubr.f32.mxu0 %v2723_v15  ;;  %v2767_v2 = vsel %vm135_vm0, 1.0, %v2723_v15 }
 0x160   :  { %v2233_v59 = vpop.eup %2232  ;;  %v2728_v19 = vmul.f32 %v2231_v10, %v2675_v5 }
 0x161   :  { %v2731_v22 = vmul.f32 %v2233_v59, %v2682_v8 }
 0x162   :  { %1989 = vmatmul.mubr.f32.gmra.mxu0 %v2728_v19 }
 0x163   :  { %v2235_v0 = vpop.eup %2234  ;;  %1991 = vmatprep.mubr.f32.mxu0 %v2731_v22  ;;  %v2753_v8 = vsel %vm135_vm0, 1.0, %v2731_v22 }
 0x164   :  { %v2738_v23 = vmul.f32 %v2235_v0, %v2685_v39  ;;  %v2760_v39 = vsel %vm135_vm0, 1.0, %v2728_v19 }
 0x166   :  { %1992 = vmatmul.mubr.f32.gmra.mxu0 %v2738_v23  ;;  %v2745_v5 = vsel %vm135_vm0, 1.0, %v2738_v23 }
 0x167   :  { %1994 = vmatprep.subr.mxu1 %v2745_v5  ;;  %2150 = vmatprep.mubr.f32.mxu0 %v2708_v45 }
 0x168   :  { %1995 = vmatpush3.msra.mxu1 %v2745_v5 }
 0x169   :  { %1996 = vmatprep.subr.mxu1 %v2753_v8 }
 0x16a   :  { %1997 = vmatpush3.msra.mxu1 %v2753_v8 }
 0x16b   :  { %1998 = vmatprep.subr.mxu1 %v2760_v39 }
 0x16c   :  { %1999 = vmatpush3.msra.mxu1 %v2760_v39 }
 0x16d   :  { %2000 = vmatprep.subr.mxu1 %v2767_v2 }
 0x16e   :  { %2001 = vmatpush3.msra.mxu1 %v2767_v2 }
 0x16f   :  { %2002 = vmatprep.subr.mxu1 %v2774_v26 }
 0x170   :  { %2003 = vmatpush3.msra.mxu1 %v2774_v26 }
 0x171   :  { %2004 = vmatprep.subr.mxu1 %v2781_v27 }
 0x172   :  { %2005 = vmatpush3.msra.mxu1 %v2781_v27 }
 0x173   :  { %2006 = vmatprep.subr.mxu1 %v2788_v30 }
 0x174   :  { %2007 = vmatpush3.msra.mxu1 %v2788_v30 }
 0x175   :  { %2008 = vmatprep.subr.mxu1 %v2795_v24 }
 0x176   :  { %2009 = vmatpush3.msra.mxu1 %v2795_v24 }
 0x21a   :  { %v1984_v31 = vpop.f32.mrf.mxu0 }
 0x21b   :  { %v382_v34 = vsel %vm134_vm1, %v1984_v31, -inf }
 0x21c   :  { %391 = vmax.xlane.f32.xlu1 %v382_v34  ;;  %v340_v35 = vpop.f32.mrf.mxu0 }
 0x21d   :  { %v381_v38 = vsel %vm134_vm1, %v340_v35, -inf }
 0x21e   :  { %389 = vmax.xlane.f32.xlu0 %v381_v38  ;;  %v1987_v25 = vpop.f32.mrf.mxu0 }
 0x21f   :  { %v384_v9 = vsel %vm134_vm1, %v1987_v25, -inf }
 0x220   :  { %395 = vmax.xlane.f32.xlu1 %v384_v9  ;;  %v350_v42 = vpop.f32.mrf.mxu0 }
 0x221   :  { %v383_v43 = vsel %vm134_vm1, %v350_v42, -inf }
 0x222   :  { %393 = vmax.xlane.f32.xlu0 %v383_v43  ;;  %v1990_v46 = vpop.f32.mrf.mxu0 }
 0x223   :  { %v386_v28 = vsel %vm134_vm1, %v1990_v46, -inf }
 0x224   :  { %399 = vmax.xlane.f32.xlu1 %v386_v28  ;;  %v360_v47 = vpop.f32.mrf.mxu0 }
 0x225   :  { %v385_v48 = vsel %vm134_vm1, %v360_v47, -inf }
 0x226   :  { %397 = vmax.xlane.f32.xlu0 %v385_v48  ;;  %v1993_v49 = vpop.f32.mrf.mxu0 }
 0x227   :  { %v388_v12 = vsel %vm134_vm1, %v1993_v49, -inf }
 0x228   :  { %403 = vmax.xlane.f32.xlu1 %v388_v12  ;;  %v370_v29 = vpop.f32.mrf.mxu0 }
 0x229   :  { %v387_v50 = vsel %vm134_vm1, %v370_v29, -inf }
 0x22a   :  { %401 = vmax.xlane.f32.xlu0 %v387_v50 }
 0x2a5   :  { %v392_v51 = vpop.xlane.xlu1 %391 }
 0x2a6   :  { %v406_v13 = vsub.f32 %v382_v34, %v392_v51 }
 0x2a7   :  { %v390_v32 = vpop.xlane.xlu0 %389 }
 0x2a8   :  { %v415_v52 = vmul.f32 1.442695, %v406_v13  ;;  %v405_v53 = vsub.f32 %v381_v38, %v390_v32 }
 0x2a9   :  { %v396_v54 = vpop.xlane.xlu1 %395 }
 0x2aa   :  { %2236 = vpow2.f32 %v415_v52  ;;  %v413_v33 = vmul.f32 1.442695, %v405_v53  ;;  %v408_v55 = vsub.f32 %v384_v9, %v396_v54 }
 0x2ab   :  { %v394_v56 = vpop.xlane.xlu0 %393 }
 0x2ac   :  { %2238 = vpow2.f32 %v413_v33  ;;  %v419_v57 = vmul.f32 1.442695, %v408_v55  ;;  %v407_v60 = vsub.f32 %v383_v43, %v394_v56 }
 0x2ad   :  { %v400_v36 = vpop.xlane.xlu1 %399 }
 0x2ae   :  { %2240 = vpow2.f32 %v419_v57  ;;  %v417_v61 = vmul.f32 1.442695, %v407_v60  ;;  %v410_v37 = vsub.f32 %v386_v28, %v400_v36 }
 0x2af   :  { %v398_v40 = vpop.xlane.xlu0 %397 }
 0x2b0   :  { %2242 = vpow2.f32 %v417_v61  ;;  %v423_v62 = vmul.f32 1.442695, %v410_v37  ;;  %v409_v63 = vsub.f32 %v385_v48, %v398_v40 }
 0x2b1   :  { %v404_v41 = vpop.xlane.xlu1 %403 }
 0x2b2   :  { %2244 = vpow2.f32 %v423_v62  ;;  %v421_v3 = vmul.f32 1.442695, %v409_v63  ;;  %v412_v16 = vsub.f32 %v388_v12, %v404_v41 }
 0x2b3   :  { %v402_v4 = vpop.xlane.xlu0 %401 }
 0x2b4   :  { %2246 = vpow2.f32 %v421_v3  ;;  %v427_v44 = vmul.f32 1.442695, %v412_v16  ;;  %v411_v17 = vsub.f32 %v387_v50, %v402_v4 }
 0x2b6   :  { %2248 = vpow2.f32 %v427_v44  ;;  %v425_v6 = vmul.f32 1.442695, %v411_v17 }
 0x2b7   :  { %v2237_v7 = vpop.eup %2236 }
 0x2b8   :  { %2250 = vpow2.f32 %v425_v6  ;;  %431 = vadd.xlane.f32.xlu1 %v2237_v7 }
 0x2b9   :  { %v2239_v14 = vpop.eup %2238 }
 0x2ba   :  { %429 = vadd.xlane.f32.xlu0 %v2239_v14 }
 0x2bb   :  { %v2241_v20 = vpop.eup %2240 }
 0x2bc   :  { %435 = vadd.xlane.f32.xlu1 %v2241_v20 }
 0x2bd   :  { %v2243_v18 = vpop.eup %2242 }
 0x2be   :  { %433 = vadd.xlane.f32.xlu0 %v2243_v18 }
 0x2bf   :  { %v2245_v10 = vpop.eup %2244 }
 0x2c0   :  { %439 = vadd.xlane.f32.xlu1 %v2245_v10 }
 0x2c1   :  { %v2247_v59 = vpop.eup %2246 }
 0x2c2   :  { %437 = vadd.xlane.f32.xlu0 %v2247_v59 }
 0x2c3   :  { %v2249_v0 = vpop.eup %2248 }
 0x2c4   :  { %443 = vadd.xlane.f32.xlu1 %v2249_v0 }
 0x2c5   :  { %v2251_v31 = vpop.eup %2250 }
 0x2c6   :  { %441 = vadd.xlane.f32.xlu0 %v2251_v31 }
 0x341   :  { %v432_v34 = vpop.xlane.xlu1 %431 }
 0x343   :  { %v430_v35 = vpop.xlane.xlu0 %429 }
 0x344   :  { %2252 = vrcp.f32 %v430_v35 }
 0x345   :  { %2254 = vrcp.f32 %v432_v34  ;;  %v436_v25 = vpop.xlane.xlu1 %435 }
 0x347   :  { %v434_v38 = vpop.xlane.xlu0 %433 }
 0x348   :  { %2256 = vrcp.f32 %v434_v38 }
 0x349   :  { %2258 = vrcp.f32 %v436_v25  ;;  %v440_v28 = vpop.xlane.xlu1 %439 }
 0x34b   :  { %v438_v9 = vpop.xlane.xlu0 %437 }
 0x34c   :  { %2260 = vrcp.f32 %v438_v9 }
 0x34d   :  { %2262 = vrcp.f32 %v440_v28  ;;  %v444_v50 = vpop.xlane.xlu1 %443 }
 0x34f   :  { %v442_v49 = vpop.xlane.xlu0 %441 }
 0x350   :  { %2264 = vrcp.f32 %v442_v49 }
 0x351   :  { %v2253_v42 = vpop.eup %2252  ;;  %2266 = vrcp.f32 %v444_v50 }
 0x352   :  { %v453_v43 = vmul.f32 %v2253_v42, %v2239_v14  ;;  %v2255_v46 = vpop.eup %2254  ;;  %v2520_v14 = vmov 32  }
 0x353   :  { %v454_v47 = vmul.f32 %v2255_v46, %v2237_v7  ;;  %2170 = vset.pattern.permute.xlu1 %v2520_v14 }
 0x354   :  { %461 = vxpose.xlu0.b32.start [1/8] (short) %v453_v43, 128 }
 0x355   :  { %v2257_v48 = vpop.eup %2256 }
 0x356   :  { %v455_v12 = vmul.f32 %v2257_v48, %v2243_v18  ;;  %v2259_v29 = vpop.eup %2258 }
 0x357   :  { %v456_v51 = vmul.f32 %v2259_v29, %v2241_v20 }
 0x358   :  { %462 = vxpose.xlu0.b32.cont [2/8] (short) %v454_v47, 128 }
 0x359   :  { %v2261_v13 = vpop.eup %2260 }
 0x35a   :  { %v457_v32 = vmul.f32 %v2261_v13, %v2247_v59  ;;  %v2263_v52 = vpop.eup %2262 }
 0x35b   :  { %v458_v53 = vmul.f32 %v2263_v52, %v2245_v10 }
 0x35c   :  { %463 = vxpose.xlu0.b32.cont [3/8] (short) %v455_v12, 128 }
 0x35d   :  { %v2265_v54 = vpop.eup %2264 }
 0x35e   :  { %v459_v33 = vmul.f32 %v2265_v54, %v2251_v31  ;;  %v2267_v55 = vpop.eup %2266 }
 0x35f   :  { %v460_v56 = vmul.f32 %v2267_v55, %v2249_v0 }
 0x360   :  { %464 = vxpose.xlu0.b32.cont [4/8] (short) %v456_v51, 128 }
 0x364   :  { %465 = vxpose.xlu0.b32.cont [5/8] (short) %v457_v32, 128 }
 0x368   :  { %466 = vxpose.xlu0.b32.cont [6/8] (short) %v458_v53, 128 }
 0x36c   :  { %467 = vxpose.xlu0.b32.cont [7/8] (short) %v459_v33, 128 }
 0x370   :  { %468 = vxpose.xlu0.b32.end [8/8] (short) %v460_v56, 128 }
 0x399   :  { %2171 = vset.pattern.permute.xlu0 %v2520_v14 }
 0x3d0   :  { %v477_v57 = vpop.trf.xlu0 }
 0x3d1   :  { %2010 = vmatprep.mubr.msk.f32.mxu1 %vm493_vm2, %v477_v57 }
 0x3d4   :  { %v478_v60 = vpop.trf.xlu0 }
 0x3d5   :  { %2011 = vmatmul.mubr.msk.f32.vlgmr.msra.gmra.mxu1 %vm493_vm2, %v478_v60 }
 0x3d8   :  { %v479_v36 = vpop.trf.xlu0 }
 0x3d9   :  { %2013 = vmatprep.mubr.msk.f32.mxu1 %vm493_vm2, %v479_v36 }
 0x3dc   :  { %v480_v61 = vpop.trf.xlu0 }
 0x3dd   :  { %2014 = vmatmul.mubr.msk.f32.gmra.mxu1 %vm493_vm2, %v480_v61 }
 0x3e0   :  { %v481_v37 = vpop.trf.xlu0 }
 0x3e1   :  { %2016 = vmatprep.mubr.msk.f32.mxu1 %vm493_vm2, %v481_v37 }
 0x3e4   :  { %v482_v40 = vpop.trf.xlu0 }
 0x3e5   :  { %2017 = vmatmul.mubr.msk.f32.gmra.mxu1 %vm493_vm2, %v482_v40 }
 0x3e8   :  { %v483_v62 = vpop.trf.xlu0 }
 0x3e9   :  { %2019 = vmatprep.mubr.msk.f32.mxu1 %vm493_vm2, %v483_v62 }
 0x3ec   :  { %v484_v63 = vpop.trf.xlu0 }
 0x3ed   :  { %2020 = vmatmul.mubr.msk.f32.gmra.mxu1 %vm493_vm2, %v484_v63 }
 0x3f0   :  { %v485_v41 = vpop.trf.xlu0 }
 0x3f1   :  { %2022 = vmatprep.mubr.msk.f32.mxu1 %vm493_vm2, %v485_v41 }
 0x3f4   :  { %v486_v3 = vpop.trf.xlu0 }
 0x3f5   :  { %2023 = vmatmul.mubr.msk.f32.gmra.mxu1 %vm493_vm2, %v486_v3 }
 0x3f8   :  { %v487_v16 = vpop.trf.xlu0 }
 0x3f9   :  { %2025 = vmatprep.mubr.msk.f32.mxu1 %vm493_vm2, %v487_v16 }
 0x3fc   :  { %v488_v4 = vpop.trf.xlu0 }
 0x3fd   :  { %2026 = vmatmul.mubr.msk.f32.gmra.mxu1 %vm493_vm2, %v488_v4 }
 0x400   :  { %v489_v44 = vpop.trf.xlu0 }
 0x401   :  { %2028 = vmatprep.mubr.msk.f32.mxu1 %vm493_vm2, %v489_v44 }
 0x404   :  { %v490_v17 = vpop.trf.xlu0 }
 0x405   :  { %2029 = vmatmul.mubr.msk.f32.gmra.mxu1 %vm493_vm2, %v490_v17 }
 0x408   :  { %v491_v6 = vpop.trf.xlu0 }
 0x409   :  { %2031 = vmatprep.mubr.msk.f32.mxu1 %vm493_vm2, %v491_v6 }
 0x40c   :  { %v492_v7 = vpop.trf.xlu0 }
 0x40d   :  { %2032 = vmatmul.mubr.msk.f32.gmra.mxu1 %vm493_vm2, %v492_v7 }
 0x40e   :  { %2066 = vmatprep.mubr.f32.mxu1 %v2708_v45 }
 0x495   :  { %v2833_v20 = vpop.f32.mrf.mxu1 }
 0x497   :  { %v2835_v18 = vpop.f32.mrf.mxu1 }
 0x498   :  { %vm687_vm3 = vcmp.gt.f32.partialorder %v2835_v18, 0.0 }
 0x499   :  { %v703_v10 = vsel %vm687_vm3, %v2835_v18, 1.0 }
 0x49a   :  { %2268 = vrcp.f32 %v703_v10 }
 0x49d   :  { %v2839_v0 = vpop.f32.mrf.mxu1 }
 0x49e   :  { %vm690_vm0 = vcmp.gt.f32.partialorder %v2839_v0, 0.0 }
 0x49f   :  { %v2841_v31 = vpop.f32.mrf.mxu1  ;;  %v706_v41 = vsel %vm690_vm0, %v2839_v0, 1.0 }
 0x4a0   :  { %vm689_vm3 = vcmp.gt.f32.partialorder %v2841_v31, 0.0 }
 0x4a1   :  { %v705_v16 = vsel %vm689_vm3, %v2841_v31, 1.0 }
 0x4a5   :  { %v2843_v34 = vpop.f32.mrf.mxu1 }
 0x4a6   :  { %vm692_vm14 = vcmp.gt.f32.partialorder %v2843_v34, 0.0 }
 0x4a7   :  { %v2269_v59 = vpop.eup %2268  ;;  %v2845_v45 = vpop.f32.mrf.mxu1  ;;  %v708_v37 = vsel %vm692_vm14, %v2843_v34, 1.0 }
 0x4a8   :  { %737 = vperm.xlu0 %2171, %v2269_v59   ;;  %vm691_vm15 = vcmp.gt.f32.partialorder %v2845_v45, 0.0 }
 0x4a9   :  { %v707_v62 = vsel %vm691_vm15, %v2845_v45, 1.0 }
 0x4ad   :  { %v2847_v35 = vpop.f32.mrf.mxu1 }
 0x4ae   :  { %vm694_vm12 = vcmp.gt.f32.partialorder %v2847_v35, 0.0 }
 0x4af   :  { %v2849_v38 = vpop.f32.mrf.mxu1  ;;  %v710_v57 = vsel %vm694_vm12, %v2847_v35, 1.0 }
 0x4b0   :  { %vm693_vm13 = vcmp.gt.f32.partialorder %v2849_v38, 0.0 }
 0x4b1   :  { %v709_v36 = vsel %vm693_vm13, %v2849_v38, 1.0 }
 0x4b5   :  { %v2851_v25 = vpop.f32.mrf.mxu1 }
 0x4b6   :  { %vm696_vm10 = vcmp.gt.f32.partialorder %v2851_v25, 0.0 }
 0x4b7   :  { %v2853_v9 = vpop.f32.mrf.mxu1  ;;  %v712_v54 = vsel %vm696_vm10, %v2851_v25, 1.0 }
 0x4b8   :  { %vm695_vm11 = vcmp.gt.f32.partialorder %v2853_v9, 0.0 }
 0x4b9   :  { %v711_v55 = vsel %vm695_vm11, %v2853_v9, 1.0 }
 0x4bd   :  { %v2855_v42 = vpop.f32.mrf.mxu1 }
 0x4be   :  { %vm698_vm8 = vcmp.gt.f32.partialorder %v2855_v42, 0.0 }
 0x4bf   :  { %v2857_v43 = vpop.f32.mrf.mxu1  ;;  %v714_v13 = vsel %vm698_vm8, %v2855_v42, 1.0 }
 0x4c0   :  { %vm697_vm9 = vcmp.gt.f32.partialorder %v2857_v43, 0.0 }
 0x4c1   :  { %v713_v52 = vsel %vm697_vm9, %v2857_v43, 1.0 }
 0x4c5   :  { %v2859_v46 = vpop.f32.mrf.mxu1 }
 0x4c6   :  { %vm700_vm4 = vcmp.gt.f32.partialorder %v2859_v46, 0.0 }
 0x4c7   :  { %v716_v28 = vsel %vm700_vm4, %v2859_v46, 1.0  ;;  %v2863_v47 = vpop.f32.mrf.mxu1  ;;  %vm688_vm4 = vcmp.gt.f32.partialorder %v2833_v20, 0.0 }
 0x4c8   :  { %2270 = vrcp.f32 %v716_v28  ;;  %vm699_vm7 = vcmp.gt.f32.partialorder %v2863_v47, 0.0  ;;  %v704_v44 = vsel %vm688_vm4, %v2833_v20, 1.0 }
 0x4c9   :  { %v715_v51 = vsel %vm699_vm7, %v2863_v47, 1.0 }
 0x4cd   :  { %v2865_v48 = vpop.f32.mrf.mxu1 }
 0x4ce   :  { %vm702_vm5 = vcmp.gt.f32.partialorder %v2865_v48, 0.0 }
 0x4cf   :  { %v718_v49 = vsel %vm702_vm5, %v2865_v48, 1.0  ;;  %v2869_v12 = vpop.f32.mrf.mxu1  ;;  %vm133_vm5 = vcmp.lt.s32.totalorder %v2733_v21, 32 }
 0x4d0   :  { %2272 = vrcp.f32 %v718_v49  ;;  %vm701_vm6 = vcmp.gt.f32.partialorder %v2869_v12, 0.0 }
 0x4d1   :  { %v717_v29 = vsel %vm701_vm6, %v2869_v12, 1.0 }
 0x4d2   :  { %2274 = vrcp.f32 %v717_v29 }
 0x4d3   :  { %2276 = vrcp.f32 %v715_v51 }
 0x4d4   :  { %2278 = vrcp.f32 %v714_v13 }
 0x4d5   :  { %v2271_v50 = vpop.eup %2270  ;;  %2280 = vrcp.f32 %v713_v52 }
 0x4d6   :  { %802 = vperm.xlu1 %2170, %v2271_v50   ;;  %2282 = vrcp.f32 %v712_v54 }
 0x4d7   :  { %2284 = vrcp.f32 %v711_v55 }
 0x4d8   :  { %2286 = vrcp.f32 %v710_v57 }
 0x4d9   :  { %2288 = vrcp.f32 %v709_v36 }
 0x4da   :  { %2290 = vrcp.f32 %v708_v37 }
 0x4db   :  { %2292 = vrcp.f32 %v707_v62 }
 0x4dc   :  { %2294 = vrcp.f32 %v706_v41 }
 0x4dd   :  { %v2273_v32 = vpop.eup %2272  ;;  %2296 = vrcp.f32 %v705_v16 }
 0x4de   :  { %812 = vperm.xlu1 %2170, %v2273_v32   ;;  %2298 = vrcp.f32 %v704_v44 }
 0x4df   :  { %v2275_v53 = vpop.eup %2274 }
 0x4e0   :  { %v2277_v33 = vpop.eup %2276 }
 0x4e1   :  { %v2279_v56 = vpop.eup %2278 }
 0x4e2   :  { %807 = vperm.xlu1 %2170, %v2275_v53   ;;  %v2281_v60 = vpop.eup %2280 }
 0x4e3   :  { %v2283_v61 = vpop.eup %2282 }
 0x4e4   :  { %v2285_v40 = vpop.eup %2284 }
 0x4e5   :  { %v2287_v63 = vpop.eup %2286 }
 0x4e6   :  { %797 = vperm.xlu1 %2170, %v2277_v33   ;;  %v2289_v3 = vpop.eup %2288 }
 0x4e7   :  { %v2291_v4 = vpop.eup %2290 }
 0x4e8   :  { %v2293_v17 = vpop.eup %2292 }
 0x4e9   :  { %v2295_v6 = vpop.eup %2294 }
 0x4ea   :  { %792 = vperm.xlu1 %2170, %v2279_v56   ;;  %v2297_v7 = vpop.eup %2296 }
 0x4eb   :  { %v2299_v14 = vpop.eup %2298 }
 0x4ee   :  { %787 = vperm.xlu1 %2170, %v2281_v60  }
 0x4f2   :  { %782 = vperm.xlu1 %2170, %v2283_v61  }
 0x4f6   :  { %777 = vperm.xlu1 %2170, %v2285_v40  }
 0x4fa   :  { %772 = vperm.xlu1 %2170, %v2287_v63  }
 0x4fe   :  { %767 = vperm.xlu1 %2170, %v2289_v3  }
 0x502   :  { %762 = vperm.xlu1 %2170, %v2291_v4  }
 0x506   :  { %757 = vperm.xlu1 %2170, %v2293_v17  }
 0x50a   :  { %752 = vperm.xlu1 %2170, %v2295_v6  }
 0x50e   :  { %747 = vperm.xlu1 %2170, %v2297_v7  }
 0x512   :  { %742 = vperm.xlu1 %2170, %v2299_v14  }
 0x551   :  { %v803_v10 = vpop.permute.xlu1 %802 }
 0x552   :  { %v828_v51 = vmul.f32 %v2859_v46, %v803_v10 }
 0x554   :  { %v2916_v54 = vsel %vm133_vm5, %v828_v51, 0.0 }
 0x555   :  { %v862_v46 = vmul.f32 %v2916_v54, %v2916_v54 }
 0x559   :  { %v813_v59 = vpop.permute.xlu1 %812 }
 0x55a   :  { %v830_v28 = vmul.f32 %v2865_v48, %v813_v59 }
 0x55c   :  { %v2901_v49 = vsel %vm133_vm5, %v830_v28, 0.0 }
 0x55d   :  { %v808_v29 = vpop.permute.xlu1 %807  ;;  %v864_v50 = vmul.f32 %v2901_v49, %v2901_v49 }
 0x55e   :  { %v829_v13 = vmul.f32 %v808_v29, %v2869_v12 }
 0x55f   :  { %895 = vadd.xlane.f32.xlu1 %v864_v50 }
 0x560   :  { %v2909_v32 = vsel %vm133_vm5, %v829_v13, 0.0 }
 0x561   :  { %v798_v48 = vpop.permute.xlu1 %797  ;;  %v863_v52 = vmul.f32 %v2909_v32, %v2909_v32 }
 0x562   :  { %v827_v53 = vmul.f32 %v798_v48, %v2863_v47 }
 0x563   :  { %893 = vadd.xlane.f32.xlu1 %v863_v52 }
 0x564   :  { %v2923_v55 = vsel %vm133_vm5, %v827_v53, 0.0 }
 0x565   :  { %v793_v33 = vpop.permute.xlu1 %792  ;;  %v861_v47 = vmul.f32 %v2923_v55, %v2923_v55 }
 0x566   :  { %v826_v12 = vmul.f32 %v2855_v42, %v793_v33  ;;  %v738_v33 = vpop.permute.xlu0 %737 }
 0x567   :  { %891 = vadd.xlane.f32.xlu1 %v862_v46 }
 0x568   :  { %v2930_v60 = vsel %vm133_vm5, %v826_v12, 0.0 }
 0x569   :  { %v788_v56 = vpop.permute.xlu1 %787  ;;  %v860_v42 = vmul.f32 %v2930_v60, %v2930_v60 }
 0x56a   :  { %v825_v57 = vmul.f32 %v788_v56, %v2857_v43  ;;  %v815_v56 = vmul.f32 %v738_v33, %v2835_v18 }
 0x56b   :  { %889 = vadd.xlane.f32.xlu1 %v861_v47 }
 0x56c   :  { %v2937_v37 = vsel %vm133_vm5, %v825_v57, 0.0 }
 0x56d   :  { %v783_v36 = vpop.permute.xlu1 %782  ;;  %v859_v43 = vmul.f32 %v2937_v37, %v2937_v37 }
 0x56e   :  { %v824_v61 = vmul.f32 %v2851_v25, %v783_v36  ;;  %v3006_v36 = vsel %vm133_vm5, %v815_v56, 0.0 }
 0x56f   :  { %887 = vadd.xlane.f32.xlu1 %v860_v42  ;;  %v849_v42 = vmul.f32 %v3006_v36, %v3006_v36 }
 0x570   :  { %v2944_v63 = vsel %vm133_vm5, %v824_v61, 0.0 }
 0x571   :  { %v778_v40 = vpop.permute.xlu1 %777  ;;  %v858_v25 = vmul.f32 %v2944_v63, %v2944_v63 }
 0x572   :  { %v823_v62 = vmul.f32 %v778_v40, %v2853_v9 }
 0x573   :  { %885 = vadd.xlane.f32.xlu1 %v859_v43 }
 0x574   :  { %v2951_v16 = vsel %vm133_vm5, %v823_v62, 0.0 }
 0x575   :  { %v773_v41 = vpop.permute.xlu1 %772  ;;  %v857_v9 = vmul.f32 %v2951_v16, %v2951_v16 }
 0x576   :  { %v822_v3 = vmul.f32 %v2847_v35, %v773_v41 }
 0x577   :  { %883 = vadd.xlane.f32.xlu1 %v858_v25 }
 0x578   :  { %v2958_v17 = vsel %vm133_vm5, %v822_v3, 0.0 }
 0x579   :  { %v768_v4 = vpop.permute.xlu1 %767  ;;  %v856_v35 = vmul.f32 %v2958_v17, %v2958_v17 }
 0x57a   :  { %v821_v44 = vmul.f32 %v768_v4, %v2849_v38 }
 0x57b   :  { %881 = vadd.xlane.f32.xlu1 %v857_v9 }
 0x57c   :  { %v2965_v14 = vsel %vm133_vm5, %v821_v44, 0.0 }
 0x57d   :  { %v763_v6 = vpop.permute.xlu1 %762  ;;  %v855_v38 = vmul.f32 %v2965_v14, %v2965_v14 }
 0x57e   :  { %v820_v7 = vmul.f32 %v2843_v34, %v763_v6 }
 0x57f   :  { %879 = vadd.xlane.f32.xlu1 %v856_v35 }
 0x580   :  { %v2971_v59 = vsel %vm133_vm5, %v820_v7, 0.0 }
 0x581   :  { %v758_v10 = vpop.permute.xlu1 %757  ;;  %v854_v34 = vmul.f32 %v2971_v59, %v2971_v59 }
 0x582   :  { %v819_v28 = vmul.f32 %v758_v10, %v2845_v45 }
 0x583   :  { %877 = vadd.xlane.f32.xlu1 %v855_v38 }
 0x584   :  { %v2976_v29 = vsel %vm133_vm5, %v819_v28, 0.0 }
 0x585   :  { %v753_v50 = vpop.permute.xlu1 %752  ;;  %v853_v51 = vmul.f32 %v2976_v29, %v2976_v29 }
 0x586   :  { %v818_v13 = vmul.f32 %v2839_v0, %v753_v50 }
 0x587   :  { %875 = vadd.xlane.f32.xlu1 %v854_v34  ;;  %873 = vadd.xlane.f32.xlu0 %v853_v51 }
 0x588   :  { %v2985_v48 = vsel %vm133_vm5, %v818_v13, 0.0 }
 0x589   :  { %v852_v45 = vmul.f32 %v2985_v48, %v2985_v48  ;;  %v748_v52 = vpop.permute.xlu1 %747 }
 0x58a   :  { %v817_v53 = vmul.f32 %v748_v52, %v2841_v31 }
 0x58b   :  { %871 = vadd.xlane.f32.xlu1 %v852_v45 }
 0x58c   :  { %v2992_v46 = vsel %vm133_vm5, %v817_v53, 0.0 }
 0x58d   :  { %v851_v0 = vmul.f32 %v2992_v46, %v2992_v46  ;;  %v743_v12 = vpop.permute.xlu1 %742 }
 0x58e   :  { %v816_v47 = vmul.f32 %v2833_v20, %v743_v12 }
 0x58f   :  { %869 = vadd.xlane.f32.xlu1 %v851_v0 }
 0x590   :  { %v3000_v57 = vsel %vm133_vm5, %v816_v47, 0.0 }
 0x591   :  { %v850_v31 = vmul.f32 %v3000_v57, %v3000_v57 }
 0x593   :  { %867 = vadd.xlane.f32.xlu1 %v850_v31 }
 0x597   :  { %865 = vadd.xlane.f32.xlu1 %v849_v42 }
 0x5e8   :  { %v896_v18 = vpop.xlane.xlu1 %895 }
 0x5e9   :  { %v912_v61 = vmax.f32 %v896_v18, 1e-16 }
 0x5eb   :  { %2300 = vrsqrt.f32 %v912_v61 }
 0x5ec   :  { %v894_v20 = vpop.xlane.xlu1 %893 }
 0x5ed   :  { %v911_v40 = vmax.f32 %v894_v20, 1e-16 }
 0x5ef   :  { %2302 = vrsqrt.f32 %v911_v40 }
 0x5f0   :  { %v892_v43 = vpop.xlane.xlu1 %891 }
 0x5f1   :  { %v910_v62 = vmax.f32 %v892_v43, 1e-16 }
 0x5f3   :  { %2304 = vrsqrt.f32 %v910_v62 }
 0x5f4   :  { %v890_v41 = vpop.xlane.xlu1 %889 }
 0x5f5   :  { %v909_v25 = vmax.f32 %v890_v41, 1e-16 }
 0x5f7   :  { %2306 = vrsqrt.f32 %v909_v25 }
 0x5f8   :  { %v2301_v3 = vpop.eup %2300  ;;  %v888_v4 = vpop.xlane.xlu1 %887 }
 0x5f9   :  { %v944_v9 = vmul.f32 5.0, %v2301_v3  ;;  %v908_v44 = vmax.f32 %v888_v4, 1e-16 }
 0x5fb   :  { %2308 = vrsqrt.f32 %v908_v44  ;;  %v960_v6 = vmul.f32 %v944_v9, %v2901_v49 }
 0x5fc   :  { %v2303_v35 = vpop.eup %2302  ;;  %v886_v7 = vpop.xlane.xlu1 %885 }
 0x5fd   :  { %v943_v10 = vmul.f32 5.0, %v2303_v35  ;;  %v907_v38 = vmax.f32 %v886_v7, 1e-16  ;;  %2034 = vmatprep.subr.mxu1 %v960_v6 }
 0x5fe   :  { %2035 = vmatpush3.xpose.msra.mxu1 %v960_v6 }
 0x5ff   :  { %2310 = vrsqrt.f32 %v907_v38  ;;  %v959_v28 = vmul.f32 %v943_v10, %v2909_v32 }
 0x600   :  { %v2305_v34 = vpop.eup %2304  ;;  %v884_v50 = vpop.xlane.xlu1 %883 }
 0x601   :  { %v942_v51 = vmul.f32 5.0, %v2305_v34  ;;  %v906_v13 = vmax.f32 %v884_v50, 1e-16  ;;  %2036 = vmatprep.subr.mxu1 %v959_v28 }
 0x602   :  { %2037 = vmatpush3.xpose.msra.mxu1 %v959_v28 }
 0x603   :  { %2312 = vrsqrt.f32 %v906_v13  ;;  %v958_v45 = vmul.f32 %v942_v51, %v2916_v54 }
 0x604   :  { %v2307_v52 = vpop.eup %2306  ;;  %v882_v49 = vpop.xlane.xlu1 %881 }
 0x605   :  { %v941_v53 = vmul.f32 5.0, %v2307_v52  ;;  %v905_v33 = vmax.f32 %v882_v49, 1e-16  ;;  %2038 = vmatprep.subr.mxu1 %v958_v45 }
 0x606   :  { %2039 = vmatpush3.xpose.msra.mxu1 %v958_v45 }
 0x607   :  { %2314 = vrsqrt.f32 %v905_v33  ;;  %v957_v0 = vmul.f32 %v941_v53, %v2923_v55 }
 0x608   :  { %v2309_v12 = vpop.eup %2308  ;;  %v880_v32 = vpop.xlane.xlu1 %879 }
 0x609   :  { %v940_v56 = vmul.f32 5.0, %v2309_v12  ;;  %v904_v47 = vmax.f32 %v880_v32, 1e-16  ;;  %2040 = vmatprep.subr.mxu1 %v957_v0 }
 0x60a   :  { %2041 = vmatpush3.xpose.msra.mxu1 %v957_v0 }
 0x60b   :  { %2316 = vrsqrt.f32 %v904_v47  ;;  %v956_v31 = vmul.f32 %v940_v56, %v2930_v60 }
 0x60c   :  { %v2311_v42 = vpop.eup %2310  ;;  %v878_v54 = vpop.xlane.xlu1 %877 }
 0x60d   :  { %v939_v18 = vmul.f32 5.0, %v2311_v42  ;;  %v903_v61 = vmax.f32 %v878_v54, 1e-16  ;;  %2042 = vmatprep.subr.mxu1 %v956_v31 }
 0x60e   :  { %2043 = vmatpush3.xpose.msra.mxu1 %v956_v31 }
 0x60f   :  { %2318 = vrsqrt.f32 %v903_v61  ;;  %v955_v20 = vmul.f32 %v939_v18, %v2937_v37 }
 0x610   :  { %v2313_v40 = vpop.eup %2312  ;;  %v876_v55 = vpop.xlane.xlu1 %875 }
 0x611   :  { %v874_v43 = vpop.xlane.xlu0 %873  ;;  %v938_v62 = vmul.f32 5.0, %v2313_v40  ;;  %v902_v41 = vmax.f32 %v876_v55, 1e-16  ;;  %2044 = vmatprep.subr.mxu1 %v955_v20 }
 0x612   :  { %v901_v25 = vmax.f32 %v874_v43, 1e-16  ;;  %2045 = vmatpush3.xpose.msra.mxu1 %v955_v20 }
 0x613   :  { %2320 = vrsqrt.f32 %v902_v41  ;;  %v954_v60 = vmul.f32 %v938_v62, %v2944_v63 }
 0x614   :  { %v2315_v3 = vpop.eup %2314  ;;  %2322 = vrsqrt.f32 %v901_v25  ;;  %v872_v4 = vpop.xlane.xlu1 %871 }
 0x615   :  { %v937_v9 = vmul.f32 5.0, %v2315_v3  ;;  %v900_v44 = vmax.f32 %v872_v4, 1e-16  ;;  %2046 = vmatprep.subr.mxu1 %v954_v60 }
 0x616   :  { %2047 = vmatpush3.xpose.msra.mxu1 %v954_v60 }
 0x617   :  { %2324 = vrsqrt.f32 %v900_v44  ;;  %v953_v37 = vmul.f32 %v937_v9, %v2951_v16 }
 0x618   :  { %v2317_v6 = vpop.eup %2316  ;;  %v870_v35 = vpop.xlane.xlu1 %869 }
 0x619   :  { %v936_v7 = vmul.f32 5.0, %v2317_v6  ;;  %v899_v10 = vmax.f32 %v870_v35, 1e-16  ;;  %2048 = vmatprep.subr.mxu1 %v953_v37 }
 0x61a   :  { %2049 = vmatpush3.xpose.msra.mxu1 %v953_v37 }
 0x61b   :  { %2326 = vrsqrt.f32 %v899_v10  ;;  %v952_v38 = vmul.f32 %v936_v7, %v2958_v17 }
 0x61c   :  { %v2319_v63 = vpop.eup %2318  ;;  %v868_v28 = vpop.xlane.xlu1 %867 }
 0x61d   :  { %v935_v34 = vmul.f32 5.0, %v2319_v63  ;;  %v898_v50 = vmax.f32 %v868_v28, 1e-16  ;;  %2050 = vmatprep.subr.mxu1 %v952_v38 }
 0x61e   :  { %2051 = vmatpush3.xpose.msra.mxu1 %v952_v38 }
 0x61f   :  { %2328 = vrsqrt.f32 %v898_v50  ;;  %v951_v51 = vmul.f32 %v935_v34, %v2965_v14 }
 0x620   :  { %v2321_v13 = vpop.eup %2320  ;;  %v866_v16 = vpop.xlane.xlu1 %865 }
 0x621   :  { %v2323_v45 = vpop.eup %2322  ;;  %v934_v52 = vmul.f32 5.0, %v2321_v13  ;;  %v897_v49 = vmax.f32 %v866_v16, 1e-16  ;;  %2052 = vmatprep.subr.mxu1 %v951_v51 }
 0x622   :  { %v933_v53 = vmul.f32 5.0, %v2323_v45  ;;  %2053 = vmatpush3.xpose.msra.mxu1 %v951_v51 }
 0x623   :  { %2330 = vrsqrt.f32 %v897_v49  ;;  %v950_v17 = vmul.f32 %v934_v52, %v2971_v59 }
 0x624   :  { %v2325_v33 = vpop.eup %2324  ;;  %v949_v12 = vmul.f32 %v933_v53, %v2976_v29 }
 0x625   :  { %v932_v0 = vmul.f32 5.0, %v2325_v33  ;;  %2054 = vmatprep.subr.mxu1 %v950_v17 }
 0x626   :  { %2055 = vmatpush3.xpose.msra.mxu1 %v950_v17 }
 0x627   :  { %2056 = vmatprep.subr.mxu1 %v949_v12  ;;  %v948_v56 = vmul.f32 %v932_v0, %v2985_v48 }
 0x628   :  { %v2327_v32 = vpop.eup %2326 }
 0x629   :  { %v931_v14 = vmul.f32 5.0, %v2327_v32 }
 0x62a   :  { %2057 = vmatpush3.xpose.msra.mxu1 %v949_v12 }
 0x62b   :  { %2058 = vmatprep.subr.mxu1 %v948_v56  ;;  %v947_v42 = vmul.f32 %v931_v14, %v2992_v46 }
 0x62c   :  { %v2329_v47 = vpop.eup %2328 }
 0x62d   :  { %v930_v31 = vmul.f32 5.0, %v2329_v47 }
 0x62e   :  { %2059 = vmatpush3.xpose.msra.mxu1 %v948_v56 }
 0x62f   :  { %2060 = vmatprep.subr.mxu1 %v947_v42  ;;  %v946_v18 = vmul.f32 %v930_v31, %v3000_v57 }
 0x630   :  { %v2331_v59 = vpop.eup %2330 }
 0x631   :  { %v929_v54 = vmul.f32 5.0, %v2331_v59 }
 0x632   :  { %2061 = vmatpush3.xpose.msra.mxu1 %v947_v42 }
 0x633   :  { %2062 = vmatprep.subr.mxu1 %v946_v18  ;;  %v945_v29 = vmul.f32 %v929_v54, %v3006_v36 }
 0x636   :  { %2063 = vmatpush3.xpose.msra.mxu1 %v946_v18 }
 0x637   :  { %2064 = vmatprep.subr.mxu1 %v945_v29 }
 0x63a   :  { %2065 = vmatpush3.xpose.msra.mxu1 %v945_v29 }
 0x63b   :  { %2078 = vmatprep.subr.mxu1 %v2745_v5 }
 0x63d   :  { %2067 = vmatmul.mubr.f32.vlgmr.msra.gmra.mxu1 %v2712_v1 }
 0x63e   :  { %2069 = vmatprep.mubr.f32.mxu1 %v2715_v11  ;;  %2079 = vmatpush3.msra.mxu1 %v2745_v5 }
 0x63f   :  { %2080 = vmatprep.subr.mxu1 %v2753_v8 }
 0x640   :  { %2081 = vmatpush3.msra.mxu1 %v2753_v8 }
 0x641   :  { %2070 = vmatmul.mubr.f32.gmra.mxu1 %v2720_v58  ;;  %2082 = vmatprep.subr.mxu1 %v2760_v39 }
 0x642   :  { %2072 = vmatprep.mubr.f32.mxu1 %v2723_v15  ;;  %2083 = vmatpush3.msra.mxu1 %v2760_v39 }
 0x643   :  { %2084 = vmatprep.subr.mxu1 %v2767_v2 }
 0x644   :  { %2085 = vmatpush3.msra.mxu1 %v2767_v2 }
 0x645   :  { %2073 = vmatmul.mubr.f32.gmra.mxu1 %v2728_v19  ;;  %2086 = vmatprep.subr.mxu1 %v2774_v26 }
 0x646   :  { %2075 = vmatprep.mubr.f32.mxu1 %v2731_v22  ;;  %2087 = vmatpush3.msra.mxu1 %v2774_v26 }
 0x647   :  { %2088 = vmatprep.subr.mxu1 %v2781_v27 }
 0x648   :  { %2089 = vmatpush3.msra.mxu1 %v2781_v27 }
 0x649   :  { %2076 = vmatmul.mubr.f32.gmra.mxu1 %v2738_v23  ;;  %2090 = vmatprep.subr.mxu1 %v2788_v30 }
 0x64a   :  { %2091 = vmatpush3.msra.mxu1 %v2788_v30 }
 0x64b   :  { %2092 = vmatprep.subr.mxu1 %v2795_v24 }
 0x64c   :  { %2093 = vmatpush3.msra.mxu1 %v2795_v24 }
 0x6fd   :  { %v2068_v5 = vpop.f32.mrf.mxu1 }
 0x6fe   :  { %v1067_v8 = vsel %vm134_vm1, %v2068_v5, -inf }
 0x6ff   :  { %1076 = vmax.xlane.f32.xlu1 %v1067_v8  ;;  %v1027_v39 = vpop.f32.mrf.mxu1 }
 0x700   :  { %v1066_v26 = vsel %vm134_vm1, %v1027_v39, -inf }
 0x701   :  { %v2071_v2 = vpop.f32.mrf.mxu1 }
 0x702   :  { %v1069_v27 = vsel %vm134_vm1, %v2071_v2, -inf }
 0x703   :  { %1074 = vmax.xlane.f32.xlu1 %v1066_v26  ;;  %1080 = vmax.xlane.f32.xlu0 %v1069_v27  ;;  %v1037_v30 = vpop.f32.mrf.mxu1 }
 0x704   :  { %v1068_v24 = vsel %vm134_vm1, %v1037_v30, -inf }
 0x705   :  { %v2074_v48 = vpop.f32.mrf.mxu1 }
 0x706   :  { %v1071_v46 = vsel %vm134_vm1, %v2074_v48, -inf }
 0x707   :  { %1078 = vmax.xlane.f32.xlu1 %v1068_v24  ;;  %1084 = vmax.xlane.f32.xlu0 %v1071_v46  ;;  %v1047_v57 = vpop.f32.mrf.mxu1 }
 0x708   :  { %v1070_v61 = vsel %vm134_vm1, %v1047_v57, -inf }
 0x709   :  { %v2077_v36 = vpop.f32.mrf.mxu1 }
 0x70a   :  { %v1073_v20 = vsel %vm134_vm1, %v2077_v36, -inf }
 0x70b   :  { %1082 = vmax.xlane.f32.xlu1 %v1070_v61  ;;  %1088 = vmax.xlane.f32.xlu0 %v1073_v20  ;;  %v1057_v40 = vpop.f32.mrf.mxu1 }
 0x70c   :  { %v1072_v55 = vsel %vm134_vm1, %v1057_v40, -inf }
 0x70f   :  { %1086 = vmax.xlane.f32.xlu1 %v1072_v55 }
 0x788   :  { %v1077_v43 = vpop.xlane.xlu1 %1076 }
 0x789   :  { %v1091_v62 = vsub.f32 %v1067_v8, %v1077_v43 }
 0x78b   :  { %v1100_v41 = vmul.f32 1.442695, %v1091_v62 }
 0x78c   :  { %v1075_v25 = vpop.xlane.xlu1 %1074  ;;  %v1081_v60 = vpop.xlane.xlu0 %1080 }
 0x78d   :  { %2332 = vpow2.f32 %v1100_v41  ;;  %v1090_v3 = vsub.f32 %v1066_v26, %v1075_v25  ;;  %v1093_v4 = vsub.f32 %v1069_v27, %v1081_v60 }
 0x78f   :  { %v1098_v9 = vmul.f32 1.442695, %v1090_v3  ;;  %v1104_v44 = vmul.f32 1.442695, %v1093_v4 }
 0x790   :  { %v1079_v37 = vpop.xlane.xlu1 %1078  ;;  %v1085_v6 = vpop.xlane.xlu0 %1084 }
 0x791   :  { %2334 = vpow2.f32 %v1098_v9  ;;  %v1092_v35 = vsub.f32 %v1068_v24, %v1079_v37  ;;  %v1095_v7 = vsub.f32 %v1071_v46, %v1085_v6 }
 0x792   :  { %2336 = vpow2.f32 %v1104_v44 }
 0x793   :  { %v1102_v10 = vmul.f32 1.442695, %v1092_v35  ;;  %v1108_v38 = vmul.f32 1.442695, %v1095_v7 }
 0x794   :  { %v1083_v63 = vpop.xlane.xlu1 %1082  ;;  %v1089_v28 = vpop.xlane.xlu0 %1088 }
 0x795   :  { %2338 = vpow2.f32 %v1102_v10  ;;  %v1094_v34 = vsub.f32 %v1070_v61, %v1083_v63  ;;  %v1097_v50 = vsub.f32 %v1073_v20, %v1089_v28 }
 0x796   :  { %2340 = vpow2.f32 %v1108_v38 }
 0x797   :  { %v1106_v51 = vmul.f32 1.442695, %v1094_v34  ;;  %v1112_v13 = vmul.f32 1.442695, %v1097_v50 }
 0x798   :  { %v1087_v16 = vpop.xlane.xlu1 %1086 }
 0x799   :  { %2342 = vpow2.f32 %v1106_v51  ;;  %v1096_v45 = vsub.f32 %v1072_v55, %v1087_v16 }
 0x79a   :  { %v2333_v52 = vpop.eup %2332  ;;  %2344 = vpow2.f32 %v1112_v13 }
 0x79b   :  { %v1110_v49 = vmul.f32 1.442695, %v1096_v45  ;;  %1116 = vadd.xlane.f32.xlu0 %v2333_v52 }
 0x79d   :  { %2346 = vpow2.f32 %v1110_v49 }
 0x79e   :  { %v2335_v53 = vpop.eup %2334 }
 0x79f   :  { %v2337_v17 = vpop.eup %2336  ;;  %1114 = vadd.xlane.f32.xlu1 %v2335_v53 }
 0x7a0   :  { %1120 = vadd.xlane.f32.xlu0 %v2337_v17 }
 0x7a2   :  { %v2339_v33 = vpop.eup %2338 }
 0x7a3   :  { %v2341_v0 = vpop.eup %2340  ;;  %1118 = vadd.xlane.f32.xlu1 %v2339_v33 }
 0x7a4   :  { %1124 = vadd.xlane.f32.xlu0 %v2341_v0 }
 0x7a6   :  { %v2343_v12 = vpop.eup %2342 }
 0x7a7   :  { %v2345_v32 = vpop.eup %2344  ;;  %1122 = vadd.xlane.f32.xlu1 %v2343_v12 }
 0x7a8   :  { %1128 = vadd.xlane.f32.xlu0 %v2345_v32 }
 0x7aa   :  { %v2347_v14 = vpop.eup %2346 }
 0x7ab   :  { %1126 = vadd.xlane.f32.xlu1 %v2347_v14 }
 0x824   :  { %v1117_v56 = vpop.xlane.xlu0 %1116 }
 0x828   :  { %v1115_v47 = vpop.xlane.xlu1 %1114 }
 0x829   :  { %2348 = vrcp.f32 %v1115_v47  ;;  %v1121_v42 = vpop.xlane.xlu0 %1120 }
 0x82a   :  { %2350 = vrcp.f32 %v1117_v56 }
 0x82c   :  { %v1119_v31 = vpop.xlane.xlu1 %1118 }
 0x82d   :  { %2352 = vrcp.f32 %v1119_v31  ;;  %v1125_v5 = vpop.xlane.xlu0 %1124 }
 0x82e   :  { %2354 = vrcp.f32 %v1121_v42 }
 0x830   :  { %v1123_v59 = vpop.xlane.xlu1 %1122 }
 0x831   :  { %2356 = vrcp.f32 %v1123_v59  ;;  %v1129_v30 = vpop.xlane.xlu0 %1128 }
 0x832   :  { %2358 = vrcp.f32 %v1125_v5 }
 0x834   :  { %v1127_v2 = vpop.xlane.xlu1 %1126 }
 0x835   :  { %2360 = vrcp.f32 %v1127_v2 }
 0x836   :  { %v2349_v54 = vpop.eup %2348  ;;  %2362 = vrcp.f32 %v1129_v30 }
 0x837   :  { %v1138_v18 = vmul.f32 %v2349_v54, %v2335_v53  ;;  %v2351_v29 = vpop.eup %2350 }
 0x838   :  { %v1139_v8 = vmul.f32 %v2351_v29, %v2333_v52 }
 0x839   :  { %1146 = vxpose.xlu1.b32.start [1/8] (short) %v1138_v18, 128 }
 0x83a   :  { %v2353_v39 = vpop.eup %2352 }
 0x83b   :  { %v1140_v26 = vmul.f32 %v2353_v39, %v2339_v33  ;;  %v2355_v27 = vpop.eup %2354 }
 0x83c   :  { %v1141_v48 = vmul.f32 %v2355_v27, %v2337_v17 }
 0x83d   :  { %1147 = vxpose.xlu1.b32.cont [2/8] (short) %v1139_v8, 128 }
 0x83e   :  { %v2357_v24 = vpop.eup %2356 }
 0x83f   :  { %v1142_v46 = vmul.f32 %v2357_v24, %v2343_v12  ;;  %v2359_v57 = vpop.eup %2358 }
 0x840   :  { %v1143_v36 = vmul.f32 %v2359_v57, %v2341_v0 }
 0x841   :  { %1148 = vxpose.xlu1.b32.cont [3/8] (short) %v1140_v26, 128 }
 0x842   :  { %v2361_v61 = vpop.eup %2360 }
 0x843   :  { %v1144_v20 = vmul.f32 %v2361_v61, %v2347_v14  ;;  %v2363_v40 = vpop.eup %2362 }
 0x844   :  { %v1145_v55 = vmul.f32 %v2363_v40, %v2345_v32 }
 0x845   :  { %1149 = vxpose.xlu1.b32.cont [4/8] (short) %v1141_v48, 128 }
 0x849   :  { %1150 = vxpose.xlu1.b32.cont [5/8] (short) %v1142_v46, 128 }
 0x84d   :  { %1151 = vxpose.xlu1.b32.cont [6/8] (short) %v1143_v36, 128 }
 0x851   :  { %1152 = vxpose.xlu1.b32.cont [7/8] (short) %v1144_v20, 128 }
 0x855   :  { %1153 = vxpose.xlu1.b32.end [8/8] (short) %v1145_v55, 128 }
 0x8b5   :  { %v1162_v43 = vpop.trf.xlu1 }
 0x8b6   :  { %2094 = vmatprep.mubr.msk.f32.mxu1 %vm493_vm2, %v1162_v43 }
 0x8b9   :  { %v1163_v62 = vpop.trf.xlu1 }
 0x8ba   :  { %2095 = vmatmul.mubr.msk.f32.vlgmr.msra.gmra.mxu1 %vm493_vm2, %v1163_v62 }
 0x8bd   :  { %v1164_v41 = vpop.trf.xlu1 }
 0x8be   :  { %2097 = vmatprep.mubr.msk.f32.mxu1 %vm493_vm2, %v1164_v41 }
 0x8c1   :  { %v1165_v25 = vpop.trf.xlu1 }
 0x8c2   :  { %2098 = vmatmul.mubr.msk.f32.gmra.mxu1 %vm493_vm2, %v1165_v25 }
 0x8c5   :  { %v1166_v60 = vpop.trf.xlu1 }
 0x8c6   :  { %2100 = vmatprep.mubr.msk.f32.mxu1 %vm493_vm2, %v1166_v60 }
 0x8c9   :  { %v1167_v3 = vpop.trf.xlu1 }
 0x8ca   :  { %2101 = vmatmul.mubr.msk.f32.gmra.mxu1 %vm493_vm2, %v1167_v3 }
 0x8cd   :  { %v1168_v4 = vpop.trf.xlu1 }
 0x8ce   :  { %2103 = vmatprep.mubr.msk.f32.mxu1 %vm493_vm2, %v1168_v4 }
 0x8d1   :  { %v1169_v9 = vpop.trf.xlu1 }
 0x8d2   :  { %2104 = vmatmul.mubr.msk.f32.gmra.mxu1 %vm493_vm2, %v1169_v9 }
 0x8d5   :  { %v1170_v44 = vpop.trf.xlu1 }
 0x8d6   :  { %2106 = vmatprep.mubr.msk.f32.mxu1 %vm493_vm2, %v1170_v44 }
 0x8d9   :  { %v1171_v37 = vpop.trf.xlu1 }
 0x8da   :  { %2107 = vmatmul.mubr.msk.f32.gmra.mxu1 %vm493_vm2, %v1171_v37 }
 0x8dd   :  { %v1172_v6 = vpop.trf.xlu1 }
 0x8de   :  { %2109 = vmatprep.mubr.msk.f32.mxu1 %vm493_vm2, %v1172_v6 }
 0x8e1   :  { %v1173_v35 = vpop.trf.xlu1 }
 0x8e2   :  { %2110 = vmatmul.mubr.msk.f32.gmra.mxu1 %vm493_vm2, %v1173_v35 }
 0x8e5   :  { %v1174_v7 = vpop.trf.xlu1 }
 0x8e6   :  { %2112 = vmatprep.mubr.msk.f32.mxu1 %vm493_vm2, %v1174_v7 }
 0x8e9   :  { %v1175_v10 = vpop.trf.xlu1 }
 0x8ea   :  { %2113 = vmatmul.mubr.msk.f32.gmra.mxu1 %vm493_vm2, %v1175_v10 }
 0x8ed   :  { %v1176_v38 = vpop.trf.xlu1 }
 0x8ee   :  { %2115 = vmatprep.mubr.msk.f32.mxu1 %vm493_vm2, %v1176_v38 }
 0x8f1   :  { %v1177_v63 = vpop.trf.xlu1 }
 0x8f2   :  { %2116 = vmatmul.mubr.msk.f32.gmra.mxu1 %vm493_vm2, %v1177_v63 }
 0x97a   :  { %v3081_v28 = vpop.f32.mrf.mxu1 }
 0x97c   :  { %v3083_v34 = vpop.f32.mrf.mxu1 }
 0x97d   :  { %vm1371_vm6 = vcmp.gt.f32.partialorder %v3083_v34, 0.0 }
 0x97e   :  { %v1387_v50 = vsel %vm1371_vm6, %v3083_v34, 1.0 }
 0x97f   :  { %2364 = vrcp.f32 %v1387_v50 }
 0x982   :  { %v3087_v13 = vpop.f32.mrf.mxu1 }
 0x983   :  { %vm1374_vm4 = vcmp.gt.f32.partialorder %v3087_v13, 0.0 }
 0x984   :  { %v3089_v16 = vpop.f32.mrf.mxu1  ;;  %v1390_v55 = vsel %vm1374_vm4, %v3087_v13, 1.0 }
 0x985   :  { %vm1373_vm6 = vcmp.gt.f32.partialorder %v3089_v16, 0.0 }
 0x986   :  { %v1389_v62 = vsel %vm1373_vm6, %v3089_v16, 1.0 }
 0x98a   :  { %v3091_v45 = vpop.f32.mrf.mxu1 }
 0x98b   :  { %vm1376_vm0 = vcmp.gt.f32.partialorder %v3091_v45, 0.0 }
 0x98c   :  { %v2365_v51 = vpop.eup %2364  ;;  %v3093_v52 = vpop.f32.mrf.mxu1  ;;  %v1392_v36 = vsel %vm1376_vm0, %v3091_v45, 1.0 }
 0x98d   :  { %1421 = vperm.xlu1 %2170, %v2365_v51   ;;  %vm1375_vm3 = vcmp.gt.f32.partialorder %v3093_v52, 0.0 }
 0x98e   :  { %v1391_v20 = vsel %vm1375_vm3, %v3093_v52, 1.0 }
 0x992   :  { %v3095_v49 = vpop.f32.mrf.mxu1 }
 0x993   :  { %vm1378_vm14 = vcmp.gt.f32.partialorder %v3095_v49, 0.0 }
 0x994   :  { %v3097_v53 = vpop.f32.mrf.mxu1  ;;  %v1394_v48 = vsel %vm1378_vm14, %v3095_v49, 1.0 }
 0x995   :  { %vm1377_vm15 = vcmp.gt.f32.partialorder %v3097_v53, 0.0 }
 0x996   :  { %v1393_v46 = vsel %vm1377_vm15, %v3097_v53, 1.0 }
 0x99a   :  { %v3099_v17 = vpop.f32.mrf.mxu1 }
 0x99b   :  { %vm1380_vm12 = vcmp.gt.f32.partialorder %v3099_v17, 0.0 }
 0x99c   :  { %v3101_v33 = vpop.f32.mrf.mxu1  ;;  %v1396_v2 = vsel %vm1380_vm12, %v3099_v17, 1.0 }
 0x99d   :  { %vm1379_vm13 = vcmp.gt.f32.partialorder %v3101_v33, 0.0 }
 0x99e   :  { %v1395_v27 = vsel %vm1379_vm13, %v3101_v33, 1.0 }
 0x9a2   :  { %v3103_v0 = vpop.f32.mrf.mxu1 }
 0x9a3   :  { %vm1382_vm10 = vcmp.gt.f32.partialorder %v3103_v0, 0.0 }
 0x9a4   :  { %v3105_v12 = vpop.f32.mrf.mxu1  ;;  %v1398_v29 = vsel %vm1382_vm10, %v3103_v0, 1.0 }
 0x9a5   :  { %vm1381_vm11 = vcmp.gt.f32.partialorder %v3105_v12, 0.0 }
 0x9a6   :  { %v1397_v8 = vsel %vm1381_vm11, %v3105_v12, 1.0 }
 0x9aa   :  { %v3107_v32 = vpop.f32.mrf.mxu1 }
 0x9ab   :  { %vm1384_vm8 = vcmp.gt.f32.partialorder %v3107_v32, 0.0 }
 0x9ac   :  { %v3109_v14 = vpop.f32.mrf.mxu1  ;;  %v1400_v59 = vsel %vm1384_vm8, %v3107_v32, 1.0 }
 0x9ad   :  { %vm1383_vm9 = vcmp.gt.f32.partialorder %v3109_v14, 0.0 }
 0x9ae   :  { %v1399_v54 = vsel %vm1383_vm9, %v3109_v14, 1.0 }
 0x9b2   :  { %v3111_v56 = vpop.f32.mrf.mxu1 }
 0x9b3   :  { %vm1386_vm2 = vcmp.gt.f32.partialorder %v3111_v56, 0.0 }
 0x9b4   :  { %v1402_v47 = vsel %vm1386_vm2, %v3111_v56, 1.0  ;;  %v3115_v31 = vpop.f32.mrf.mxu1  ;;  %vm1372_vm2 = vcmp.gt.f32.partialorder %v3081_v28, 0.0 }
 0x9b5   :  { %2366 = vrcp.f32 %v1402_v47  ;;  %vm1385_vm7 = vcmp.gt.f32.partialorder %v3115_v31, 0.0  ;;  %v1388_v25 = vsel %vm1372_vm2, %v3081_v28, 1.0 }
 0x9b6   :  { %v1401_v42 = vsel %vm1385_vm7, %v3115_v31, 1.0 }
 0x9b7   :  { %2368 = vrcp.f32 %v1401_v42 }
 0x9b8   :  { %2370 = vrcp.f32 %v1400_v59 }
 0x9b9   :  { %2372 = vrcp.f32 %v1399_v54 }
 0x9ba   :  { %2374 = vrcp.f32 %v1398_v29 }
 0x9bb   :  { %2376 = vrcp.f32 %v1397_v8 }
 0x9bc   :  { %2378 = vrcp.f32 %v1396_v2 }
 0x9bd   :  { %2380 = vrcp.f32 %v1395_v27 }
 0x9be   :  { %2382 = vrcp.f32 %v1394_v48 }
 0x9bf   :  { %2384 = vrcp.f32 %v1393_v46 }
 0x9c0   :  { %2386 = vrcp.f32 %v1392_v36 }
 0x9c1   :  { %2388 = vrcp.f32 %v1391_v20 }
 0x9c2   :  { %v2367_v18 = vpop.eup %2366  ;;  %2390 = vrcp.f32 %v1390_v55 }
 0x9c3   :  { %1496 = vperm.xlu0 %2171, %v2367_v18   ;;  %2392 = vrcp.f32 %v1389_v62 }
 0x9c4   :  { %v2369_v5 = vpop.eup %2368  ;;  %2394 = vrcp.f32 %v1388_v25 }
 0x9c5   :  { %v2371_v39 = vpop.eup %2370 }
 0x9c6   :  { %v2373_v26 = vpop.eup %2372 }
 0x9c7   :  { %1491 = vperm.xlu0 %2171, %v2369_v5   ;;  %v2375_v30 = vpop.eup %2374 }
 0x9c8   :  { %v2377_v24 = vpop.eup %2376 }
 0x9c9   :  { %v2379_v57 = vpop.eup %2378 }
 0x9ca   :  { %v2381_v61 = vpop.eup %2380 }
 0x9cb   :  { %1486 = vperm.xlu0 %2171, %v2371_v39   ;;  %v2383_v40 = vpop.eup %2382 }
 0x9cc   :  { %v2385_v43 = vpop.eup %2384 }
 0x9cd   :  { %v2387_v41 = vpop.eup %2386 }
 0x9ce   :  { %v2389_v60 = vpop.eup %2388 }
 0x9cf   :  { %1481 = vperm.xlu0 %2171, %v2373_v26   ;;  %v2391_v3 = vpop.eup %2390 }
 0x9d0   :  { %v2393_v4 = vpop.eup %2392 }
 0x9d1   :  { %v2395_v9 = vpop.eup %2394 }
 0x9d3   :  { %1476 = vperm.xlu0 %2171, %v2375_v30  }
 0x9d7   :  { %1471 = vperm.xlu0 %2171, %v2377_v24  }
 0x9db   :  { %1466 = vperm.xlu0 %2171, %v2379_v57  }
 0x9df   :  { %1461 = vperm.xlu0 %2171, %v2381_v61  }
 0x9e3   :  { %1456 = vperm.xlu0 %2171, %v2383_v40  }
 0x9e7   :  { %1451 = vperm.xlu0 %2171, %v2385_v43  }
 0x9eb   :  { %1446 = vperm.xlu0 %2171, %v2387_v41  }
 0x9ef   :  { %1441 = vperm.xlu0 %2171, %v2389_v60  }
 0x9f3   :  { %1436 = vperm.xlu0 %2171, %v2391_v3  }
 0x9f7   :  { %1431 = vperm.xlu0 %2171, %v2393_v4  }
 0x9fb   :  { %1426 = vperm.xlu0 %2171, %v2395_v9  }
 0xa08   :  { %v1422_v44 = vpop.permute.xlu1 %1421 }
 0xa09   :  { %v3146_v37 = vmul.f32 %v1422_v44, %v3083_v34 }
 0xa0b   :  { %v1515_v6 = vsel %vm133_vm5, %v3146_v37, 0.0 }
 0xa0c   :  { %1724 = vst [vmem:[#allocation7] sm:$0xff] %v1515_v6 }
 0xa3e   :  { %v1497_v35 = vpop.permute.xlu0 %1496 }
 0xa3f   :  { %v1514_v7 = vmul.f32 %v3111_v56, %v1497_v35 }
 0xa41   :  { %v1530_v10 = vsel %vm133_vm5, %v1514_v7, 0.0  ;;  %2118 = vmatprep.subr.msk.mxu0 %vm133_vm5, %v1514_v7 }
 0xa42   :  { %1739 = vst [vmem:[#allocation7 + $0x78] sm:$0xff] %v1530_v10  ;;  %2119 = vmatpush3.xpose.msk.msra.mxu0 %vm133_vm5, %v1514_v7  ;;  %v1492_v38 = vpop.permute.xlu0 %1491 }
 0xa43   :  { %v1513_v63 = vmul.f32 %v1492_v38, %v3115_v31 }
 0xa45   :  { %v1529_v34 = vsel %vm133_vm5, %v1513_v63, 0.0  ;;  %2120 = vmatprep.subr.msk.mxu0 %vm133_vm5, %v1513_v63 }
 0xa46   :  { %1738 = vst [vmem:[#allocation7 + $0x70] sm:$0xff] %v1529_v34  ;;  %2121 = vmatpush3.xpose.msk.msra.mxu0 %vm133_vm5, %v1513_v63  ;;  %v1487_v50 = vpop.permute.xlu0 %1486 }
 0xa47   :  { %v1512_v51 = vmul.f32 %v3107_v32, %v1487_v50 }
 0xa49   :  { %v1528_v56 = vsel %vm133_vm5, %v1512_v51, 0.0  ;;  %2122 = vmatprep.subr.msk.mxu0 %vm133_vm5, %v1512_v51 }
 0xa4a   :  { %1737 = vst [vmem:[#allocation7 + $0x68] sm:$0xff] %v1528_v56  ;;  %2123 = vmatpush3.xpose.msk.msra.mxu0 %vm133_vm5, %v1512_v51  ;;  %v1482_v47 = vpop.permute.xlu0 %1481 }
 0xa4b   :  { %v1511_v31 = vmul.f32 %v1482_v47, %v3109_v14 }
 0xa4d   :  { %v1527_v42 = vsel %vm133_vm5, %v1511_v31, 0.0  ;;  %2124 = vmatprep.subr.msk.mxu0 %vm133_vm5, %v1511_v31 }
 0xa4e   :  { %1736 = vst [vmem:[#allocation7 + $0x60] sm:$0xff] %v1527_v42  ;;  %2125 = vmatpush3.xpose.msk.msra.mxu0 %vm133_vm5, %v1511_v31  ;;  %v1477_v32 = vpop.permute.xlu0 %1476 }
 0xa4f   :  { %v1510_v59 = vmul.f32 %v3103_v0, %v1477_v32 }
 0xa51   :  { %v1526_v54 = vsel %vm133_vm5, %v1510_v59, 0.0  ;;  %2126 = vmatprep.subr.msk.mxu0 %vm133_vm5, %v1510_v59 }
 0xa52   :  { %1735 = vst [vmem:[#allocation7 + $0x58] sm:$0xff] %v1526_v54  ;;  %2127 = vmatpush3.xpose.msk.msra.mxu0 %vm133_vm5, %v1510_v59  ;;  %v1472_v14 = vpop.permute.xlu0 %1471 }
 0xa53   :  { %v1509_v18 = vmul.f32 %v1472_v14, %v3105_v12 }
 0xa55   :  { %v1525_v29 = vsel %vm133_vm5, %v1509_v18, 0.0  ;;  %2128 = vmatprep.subr.msk.mxu0 %vm133_vm5, %v1509_v18 }
 0xa56   :  { %1734 = vst [vmem:[#allocation7 + $0x50] sm:$0xff] %v1525_v29  ;;  %2129 = vmatpush3.xpose.msk.msra.mxu0 %vm133_vm5, %v1509_v18  ;;  %v1467_v0 = vpop.permute.xlu0 %1466 }
 0xa57   :  { %v1508_v5 = vmul.f32 %v3099_v17, %v1467_v0 }
 0xa59   :  { %v1524_v8 = vsel %vm133_vm5, %v1508_v5, 0.0  ;;  %2130 = vmatprep.subr.msk.mxu0 %vm133_vm5, %v1508_v5 }
 0xa5a   :  { %1733 = vst [vmem:[#allocation7 + $0x48] sm:$0xff] %v1524_v8  ;;  %2131 = vmatpush3.xpose.msk.msra.mxu0 %vm133_vm5, %v1508_v5  ;;  %v1462_v12 = vpop.permute.xlu0 %1461 }
 0xa5b   :  { %v1507_v39 = vmul.f32 %v1462_v12, %v3101_v33 }
 0xa5d   :  { %v1523_v2 = vsel %vm133_vm5, %v1507_v39, 0.0  ;;  %2132 = vmatprep.subr.msk.mxu0 %vm133_vm5, %v1507_v39 }
 0xa5e   :  { %1732 = vst [vmem:[#allocation7 + $0x40] sm:$0xff] %v1523_v2  ;;  %2133 = vmatpush3.xpose.msk.msra.mxu0 %vm133_vm5, %v1507_v39  ;;  %v1457_v17 = vpop.permute.xlu0 %1456 }
 0xa5f   :  { %v1506_v26 = vmul.f32 %v3095_v49, %v1457_v17 }
 0xa61   :  { %v1522_v27 = vsel %vm133_vm5, %v1506_v26, 0.0  ;;  %2134 = vmatprep.subr.msk.mxu0 %vm133_vm5, %v1506_v26 }
 0xa62   :  { %1731 = vst [vmem:[#allocation7 + $0x38] sm:$0xff] %v1522_v27  ;;  %2135 = vmatpush3.xpose.msk.msra.mxu0 %vm133_vm5, %v1506_v26  ;;  %v1452_v33 = vpop.permute.xlu0 %1451 }
 0xa63   :  { %v1505_v30 = vmul.f32 %v1452_v33, %v3097_v53 }
 0xa65   :  { %v1521_v48 = vsel %vm133_vm5, %v1505_v30, 0.0  ;;  %2136 = vmatprep.subr.msk.mxu0 %vm133_vm5, %v1505_v30 }
 0xa66   :  { %1730 = vst [vmem:[#allocation7 + $0x30] sm:$0xff] %v1521_v48  ;;  %2137 = vmatpush3.xpose.msk.msra.mxu0 %vm133_vm5, %v1505_v30  ;;  %v1447_v49 = vpop.permute.xlu0 %1446 }
 0xa67   :  { %v1504_v24 = vmul.f32 %v3091_v45, %v1447_v49 }
 0xa69   :  { %v1520_v46 = vsel %vm133_vm5, %v1504_v24, 0.0  ;;  %2138 = vmatprep.subr.msk.mxu0 %vm133_vm5, %v1504_v24 }
 0xa6a   :  { %1729 = vst [vmem:[#allocation7 + $0x28] sm:$0xff] %v1520_v46  ;;  %2139 = vmatpush3.xpose.msk.msra.mxu0 %vm133_vm5, %v1504_v24  ;;  %v1442_v53 = vpop.permute.xlu0 %1441 }
 0xa6b   :  { %v1503_v57 = vmul.f32 %v1442_v53, %v3093_v52 }
 0xa6d   :  { %v1519_v36 = vsel %vm133_vm5, %v1503_v57, 0.0  ;;  %2140 = vmatprep.subr.msk.mxu0 %vm133_vm5, %v1503_v57 }
 0xa6e   :  { %1728 = vst [vmem:[#allocation7 + $0x20] sm:$0xff] %v1519_v36  ;;  %2141 = vmatpush3.xpose.msk.msra.mxu0 %vm133_vm5, %v1503_v57  ;;  %v1437_v45 = vpop.permute.xlu0 %1436 }
 0xa6f   :  { %v1502_v61 = vmul.f32 %v3087_v13, %v1437_v45 }
 0xa71   :  { %v1518_v20 = vsel %vm133_vm5, %v1502_v61, 0.0  ;;  %2142 = vmatprep.subr.msk.mxu0 %vm133_vm5, %v1502_v61 }
 0xa72   :  { %1727 = vst [vmem:[#allocation7 + $0x18] sm:$0xff] %v1518_v20  ;;  %2143 = vmatpush3.xpose.msk.msra.mxu0 %vm133_vm5, %v1502_v61  ;;  %v1432_v52 = vpop.permute.xlu0 %1431 }
 0xa73   :  { %v1501_v40 = vmul.f32 %v1432_v52, %v3089_v16 }
 0xa75   :  { %v1517_v55 = vsel %vm133_vm5, %v1501_v40, 0.0  ;;  %2144 = vmatprep.subr.msk.mxu0 %vm133_vm5, %v1501_v40 }
 0xa76   :  { %1726 = vst [vmem:[#allocation7 + $0x10] sm:$0xff] %v1517_v55  ;;  %2145 = vmatpush3.xpose.msk.msra.mxu0 %vm133_vm5, %v1501_v40  ;;  %v1427_v13 = vpop.permute.xlu0 %1426 }
 0xa77   :  { %v1500_v43 = vmul.f32 %v3081_v28, %v1427_v13 }
 0xa79   :  { %v1516_v62 = vsel %vm133_vm5, %v1500_v43, 0.0  ;;  %2146 = vmatprep.subr.msk.mxu0 %vm133_vm5, %v1500_v43 }
 0xa7a   :  { %1725 = vst [vmem:[#allocation7 + $0x8] sm:$0xff] %v1516_v62  ;;  %2147 = vmatpush3.xpose.msk.msra.mxu0 %vm133_vm5, %v1500_v43 }
 0xa7b   :  { %2148 = vmatprep.subr.msk.mxu0 %vm133_vm5, %v3146_v37 }
 0xa7e   :  { %2149 = vmatpush3.xpose.msk.msra.mxu0 %vm133_vm5, %v3146_v37 }
 0xa81   :  { %2151 = vmatmul.mubr.f32.vlgmr.msra.gmra.mxu0 %v2712_v1 }
 0xa82   :  { %2153 = vmatprep.mubr.f32.mxu0 %v2715_v11 }
 0xa85   :  { %2154 = vmatmul.mubr.f32.gmra.mxu0 %v2720_v58 }
 0xa86   :  { %2156 = vmatprep.mubr.f32.mxu0 %v2723_v15 }
 0xa89   :  { %2157 = vmatmul.mubr.f32.gmra.mxu0 %v2728_v19 }
 0xa8a   :  { %2159 = vmatprep.mubr.f32.mxu0 %v2731_v22 }
 0xa8d   :  { %2160 = vmatmul.mubr.f32.gmra.mxu0 %v2738_v23 }
 0xb41   :  { %v2152_v28 = vpop.f32.mrf.mxu0 }
 0xb42   :  { %v1637_v16 = vmul.f32 5.0, %v2152_v28 }
 0xb43   :  { %v1597_v41 = vpop.f32.mrf.mxu0 }
 0xb44   :  { %v1636_v25 = vmul.f32 5.0, %v1597_v41  ;;  %v1645_v60 = vsel %vm134_vm1, %v1637_v16, -inf }
 0xb45   :  { %1654 = vmax.xlane.f32.xlu0 %v1645_v60  ;;  %v2155_v1 = vpop.f32.mrf.mxu0 }
 0xb46   :  { %v1639_v3 = vmul.f32 5.0, %v2155_v1  ;;  %v1644_v58 = vsel %vm134_vm1, %v1636_v25, -inf }
 0xb47   :  { %v1607_v11 = vpop.f32.mrf.mxu0 }
 0xb48   :  { %v1638_v19 = vmul.f32 5.0, %v1607_v11  ;;  %v1647_v22 = vsel %vm134_vm1, %v1639_v3, -inf }
 0xb49   :  { %1652 = vmax.xlane.f32.xlu0 %v1644_v58  ;;  %v2158_v15 = vpop.f32.mrf.mxu0 }
 0xb4a   :  { %v1641_v4 = vmul.f32 5.0, %v2158_v15  ;;  %v1646_v9 = vsel %vm134_vm1, %v1638_v19, -inf }
 0xb4b   :  { %v1617_v23 = vpop.f32.mrf.mxu0 }
 0xb4c   :  { %v1640_v37 = vmul.f32 5.0, %v1617_v23  ;;  %v1649_v6 = vsel %vm134_vm1, %v1641_v4, -inf }
 0xb4d   :  { %1658 = vmax.xlane.f32.xlu0 %v1647_v22  ;;  %v2161_v44 = vpop.f32.mrf.mxu0 }
 0xb4e   :  { %v1648_v10 = vsel %vm134_vm1, %v1640_v37, -inf  ;;  %v1643_v38 = vmul.f32 5.0, %v2161_v44 }
 0xb4f   :  { %v1627_v35 = vpop.f32.mrf.mxu0 }
 0xb50   :  { %v1642_v7 = vmul.f32 5.0, %v1627_v35  ;;  %v1651_v34 = vsel %vm134_vm1, %v1643_v38, -inf }
 0xb51   :  { %1656 = vmax.xlane.f32.xlu0 %v1646_v9 }
 0xb52   :  { %v1650_v63 = vsel %vm134_vm1, %v1642_v7, -inf }
 0xb55   :  { %1662 = vmax.xlane.f32.xlu0 %v1649_v6 }
 0xb59   :  { %1660 = vmax.xlane.f32.xlu0 %v1648_v10 }
 0xb5d   :  { %1664 = vmax.xlane.f32.xlu0 %v1650_v63 }
 0xb61   :  { %1666 = vmax.xlane.f32.xlu0 %v1651_v34 }
 0xbce   :  { %v1655_v50 = vpop.xlane.xlu0 %1654 }
 0xbcf   :  { %v1669_v51 = vsub.f32 %v1645_v60, %v1655_v50 }
 0xbd1   :  { %v1678_v56 = vmul.f32 1.442695, %v1669_v51 }
 0xbd2   :  { %v1653_v47 = vpop.xlane.xlu0 %1652 }
 0xbd3   :  { %2396 = vpow2.f32 %v1678_v56  ;;  %v1668_v31 = vsub.f32 %v1644_v58, %v1653_v47 }
 0xbd5   :  { %v1676_v42 = vmul.f32 1.442695, %v1668_v31 }
 0xbd6   :  { %v1659_v32 = vpop.xlane.xlu0 %1658 }
 0xbd7   :  { %2398 = vpow2.f32 %v1676_v42  ;;  %v1671_v59 = vsub.f32 %v1647_v22, %v1659_v32 }
 0xbd9   :  { %v1682_v54 = vmul.f32 1.442695, %v1671_v59 }
 0xbda   :  { %v1657_v14 = vpop.xlane.xlu0 %1656 }
 0xbdb   :  { %2400 = vpow2.f32 %v1682_v54  ;;  %v1670_v18 = vsub.f32 %v1646_v9, %v1657_v14 }
 0xbdd   :  { %v1680_v29 = vmul.f32 1.442695, %v1670_v18 }
 0xbde   :  { %v1663_v0 = vpop.xlane.xlu0 %1662 }
 0xbdf   :  { %2402 = vpow2.f32 %v1680_v29  ;;  %v1673_v21 = vsub.f32 %v1649_v6, %v1663_v0 }
 0xbe0   :  { %v2397_v5 = vpop.eup %2396 }
 0xbe1   :  { %v1686_v8 = vmul.f32 1.442695, %v1673_v21  ;;  %1694 = vadd.xlane.f32.xlu1 %v2397_v5 }
 0xbe2   :  { %v1661_v12 = vpop.xlane.xlu0 %1660 }
 0xbe3   :  { %2404 = vpow2.f32 %v1686_v8  ;;  %v1672_v39 = vsub.f32 %v1648_v10, %v1661_v12 }
 0xbe4   :  { %v2399_v2 = vpop.eup %2398 }
 0xbe5   :  { %v1684_v17 = vmul.f32 1.442695, %v1672_v39  ;;  %1692 = vadd.xlane.f32.xlu0 %v2399_v2 }
 0xbe6   :  { %v1665_v26 = vpop.xlane.xlu0 %1664 }
 0xbe7   :  { %2406 = vpow2.f32 %v1684_v17  ;;  %v1674_v27 = vsub.f32 %v1650_v63, %v1665_v26 }
 0xbe8   :  { %v2401_v33 = vpop.eup %2400 }
 0xbe9   :  { %v1688_v30 = vmul.f32 1.442695, %v1674_v27  ;;  %1698 = vadd.xlane.f32.xlu0 %v2401_v33 }
 0xbea   :  { %v1667_v48 = vpop.xlane.xlu0 %1666 }
 0xbeb   :  { %2408 = vpow2.f32 %v1688_v30  ;;  %v1675_v49 = vsub.f32 %v1651_v34, %v1667_v48 }
 0xbec   :  { %v2403_v24 = vpop.eup %2402 }
 0xbed   :  { %v1690_v46 = vmul.f32 1.442695, %v1675_v49  ;;  %1696 = vadd.xlane.f32.xlu0 %v2403_v24 }
 0xbef   :  { %2410 = vpow2.f32 %v1690_v46 }
 0xbf0   :  { %v2405_v53 = vpop.eup %2404 }
 0xbf1   :  { %1702 = vadd.xlane.f32.xlu0 %v2405_v53 }
 0xbf4   :  { %v2407_v57 = vpop.eup %2406 }
 0xbf5   :  { %1700 = vadd.xlane.f32.xlu0 %v2407_v57 }
 0xbf8   :  { %v2409_v36 = vpop.eup %2408 }
 0xbf9   :  { %1704 = vadd.xlane.f32.xlu0 %v2409_v36 }
 0xbfc   :  { %v2411_v45 = vpop.eup %2410 }
 0xbfd   :  { %1706 = vadd.xlane.f32.xlu0 %v2411_v45 }
 0xbfe   :  { %2479 = shalt.err (!%p2476_p0)
}
 0xbff   :  { %1759 = dma.vmem_to_hbm [thread:$0]  %s1754_s1, 2048, %s3299_s2, [#allocation4], %s2517_s15, %s2517_s15, %s2518_s16  }
 0xc00   :  { %s2522_s2 = smov [#allocation8]  }
 0xc01   :  { %s1765_s27 = sshll.u32 %s2522_s2, 4  ;;  %s1766_s27 = int_to_ptr.vmem [resolvable:$true] %s1765_s27 }
 0xc02   :  { %s2488_s28 = scalar_lea.vmem %s1766_s27, 1024  ;;  %p2493_p2 = scmp.lt.s32.totalorder %s1766_s27, %s1766_s27 }
 0xc03   :  { %p2489_p1 = scmp.ne.s32.totalorder %s1766_s27, %s2488_s28  ;;  %p2494_p3 = scmp.lt.s32.totalorder %s2488_s28, %s2488_s28 }
 0xc05   :  { %p2495_p4 = por %p2494_p3, %p2493_p2 }
 0xc07   :  { %p2496_p5 = pnand %p2495_p4, %p2489_p1 }
 0xc6a   :  { %v1695_v61 = vpop.xlane.xlu1 %1694 }
 0xc6b   :  { %2412 = vrcp.f32 %v1695_v61 }
 0xc6e   :  { %v1693_v20 = vpop.xlane.xlu0 %1692 }
 0xc6f   :  { %2414 = vrcp.f32 %v1693_v20 }
 0xc72   :  { %v1699_v52 = vpop.xlane.xlu0 %1698 }
 0xc73   :  { %2416 = vrcp.f32 %v1699_v52 }
 0xc76   :  { %v1697_v40 = vpop.xlane.xlu0 %1696 }
 0xc77   :  { %2418 = vrcp.f32 %v1697_v40 }
 0xc78   :  { %v2413_v55 = vpop.eup %2412 }
 0xc79   :  { %v1717_v13 = vmul.f32 %v2413_v55, %v2397_v5 }
 0xc7a   :  { %v1703_v43 = vpop.xlane.xlu0 %1702 }
 0xc7b   :  { %1741 = vst [vmem:[#allocation8 + $0x8] sm:$0xff] %v1717_v13  ;;  %2420 = vrcp.f32 %v1703_v43 }
 0xc7c   :  { %v2415_v62 = vpop.eup %2414 }
 0xc7d   :  { %v1716_v28 = vmul.f32 %v2415_v62, %v2399_v2 }
 0xc7e   :  { %v1701_v16 = vpop.xlane.xlu0 %1700 }
 0xc7f   :  { %1740 = vst [vmem:[#allocation8] sm:$0xff] %v1716_v28  ;;  %2422 = vrcp.f32 %v1701_v16 }
 0xc80   :  { %v2417_v41 = vpop.eup %2416 }
 0xc81   :  { %v1719_v25 = vmul.f32 %v2417_v41, %v2401_v33 }
 0xc82   :  { %v1705_v60 = vpop.xlane.xlu0 %1704 }
 0xc83   :  { %1743 = vst [vmem:[#allocation8 + $0x18] sm:$0xff] %v1719_v25  ;;  %2424 = vrcp.f32 %v1705_v60 }
 0xc84   :  { %v2419_v1 = vpop.eup %2418 }
 0xc85   :  { %v1718_v11 = vmul.f32 %v2419_v1, %v2403_v24 }
 0xc86   :  { %v1707_v3 = vpop.xlane.xlu0 %1706 }
 0xc87   :  { %1742 = vst [vmem:[#allocation8 + $0x10] sm:$0xff] %v1718_v11  ;;  %2426 = vrcp.f32 %v1707_v3 }
 0xc88   :  { %v2421_v58 = vpop.eup %2420 }
 0xc89   :  { %v1721_v15 = vmul.f32 %v2421_v58, %v2405_v53 }
 0xc8b   :  { %1745 = vst [vmem:[#allocation8 + $0x28] sm:$0xff] %v1721_v15 }
 0xc8c   :  { %v2423_v19 = vpop.eup %2422 }
 0xc8d   :  { %v1720_v22 = vmul.f32 %v2423_v19, %v2407_v57 }
 0xc8f   :  { %1744 = vst [vmem:[#allocation8 + $0x20] sm:$0xff] %v1720_v22 }
 0xc90   :  { %v2425_v23 = vpop.eup %2424 }
 0xc91   :  { %v1722_v4 = vmul.f32 %v2425_v23, %v2409_v36 }
 0xc93   :  { %1746 = vst [vmem:[#allocation8 + $0x30] sm:$0xff] %v1722_v4 }
 0xc94   :  { %v2427_v9 = vpop.eup %2426 }
 0xc95   :  { %v1723_v44 = vmul.f32 %v2427_v9, %v2411_v45 }
 0xc97   :  { %1747 = vst [vmem:[#allocation8 + $0x38] sm:$0xff] %v1723_v44 }
 0xc98   :  { %2499 = shalt.err (!%p2496_p5)
}
 0xc99   :  { %1771 = dma.vmem_to_hbm [thread:$0]  %s1766_s27, 1024, %s3300_s3, [#allocation9], %s2517_s15, %s2517_s15, %s2518_s16  }
 0xc9a   :  { %2512 = dma.done.wait [#allocation4], 2048  }
 0xc9b   :  { %2513 = vsyncadd [#allocation4], 4294965248 }
 0xc9c   :  { %2514 = dma.done.wait [#allocation9], 1024  }
 0xc9d   :  { %2515 = vsyncadd [#allocation9], 4294966272 }
 0xc9e   :  { %1778 = vsyncpa [#allocation3], 1 }
 0xc9f   :  { %1779 = vsyncpa [#allocation6], 1 }
 0xca0   :  { %1780 = vsyncpa [#allocation4], 1 }
 0xca1   :  { %1781 = vsyncpa [#allocation9], 1 }

</bundles_post_ra>
